<compile_context>
chip_gen: v7x
topology: tpu7x:2x2x1
jax: 0.10.0
libtpu: 0.0.40
codegen_flags: <defaults>
</compile_context>

<pallas_src>
import math
from functools import partial

import jax
import jax.numpy as jnp
from jax.experimental import pallas as pl
from jax.experimental.pallas import tpu as pltpu


def _attention_tail(Q, K, V, wo_ref, bo_ref, out_ref, attn_ref, *,
                    n_heads, head_dim, compute_dtype):
    """Shared epilogue: per-head (batch-batched) attention + head merge + output projection.

    Q, K, V: (rows, H) float32 with rows = b_blk * L.
    """
    b_blk, L, H = out_ref.shape
    nh, hd = n_heads, head_dim
    cd = compute_dtype

    # Fold the 1/sqrt(head_dim) scaling into Q once (fp32), then view as (b_blk, L, H).
    scale = 1.0 / math.sqrt(float(hd))
    Q3 = (Q * scale).reshape(b_blk, L, H)
    K3 = K.reshape(b_blk, L, H)
    V3 = V.reshape(b_blk, L, H)

    attn_heads = []
    ctx_heads = []
    for h in range(nh):                       # static unroll over heads only (nh iterations)
        sl = slice(h * hd, (h + 1) * hd)      # lane-dim slice; batch stays vectorized
        Qh = Q3[:, :, sl].astype(cd)          # (b_blk, L, hd)
        Kh = K3[:, :, sl].astype(cd)
        Vh = V3[:, :, sl].astype(cd)

        # Batched-over-batch attention scores, fp32 accumulation on the MXU.
        energy = jnp.einsum('bqd,bkd->bqk', Qh, Kh,
                            preferred_element_type=jnp.float32)     # (b_blk, L, L)
        # TODO(synk): mask branch (masked_fill with -1e10) not implemented; kernel assumes mask=None.

        # Numerically-stable softmax; denominator via approx reciprocal (EUP) + one Newton step.
        m = jnp.max(energy, axis=-1, keepdims=True)
        p = jnp.exp(energy - m)
        denom = jnp.sum(p, axis=-1, keepdims=True)
        inv = pl.reciprocal(denom, approx=True)
        inv = inv * (2.0 - denom * inv)        # Newton refinement -> ~fp32-exact
        attn_h = p * inv                       # (b_blk, L, L) fp32
        attn_heads.append(attn_h.reshape(b_blk, 1, L, L))

        # TODO(synk): attention dropout is identity at inference; not implemented.
        ctx_heads.append(jnp.einsum('bqk,bkd->bqd', attn_h.astype(cd), Vh,
                                    preferred_element_type=jnp.float32))  # (b_blk, L, hd)

    # Single consolidated store of the attention weights per grid step.
    attn_ref[...] = jnp.concatenate(attn_heads, axis=1).astype(attn_ref.dtype)

    # Merge heads: one lane-dim concatenate -> (b_blk, L, H) (== permute+contiguous in PyTorch).
    ctx = jnp.concatenate(ctx_heads, axis=-1)
    x = ctx.reshape(b_blk * L, H)

    out = jnp.dot(x.astype(cd), wo_ref[...],
                  preferred_element_type=jnp.float32) + bo_ref[0]
    out_ref[...] = out.reshape(b_blk, L, H).astype(out_ref.dtype)


def mha_kernel(q_ref, k_ref, v_ref,
               wq_ref, bq_ref, wk_ref, bk_ref, wv_ref, bv_ref, wo_ref, bo_ref,
               out_ref, attn_ref, *, n_heads, head_dim, compute_dtype):
    """General path: separate Q/K/V projections (cross-attention capable)."""
    b_blk, L, H = q_ref.shape
    rows = b_blk * L
    cd = compute_dtype

    q2 = q_ref[...].reshape(rows, H).astype(cd)
    k2 = k_ref[...].reshape(rows, H).astype(cd)
    v2 = v_ref[...].reshape(rows, H).astype(cd)

    Q = jnp.dot(q2, wq_ref[...], preferred_element_type=jnp.float32) + bq_ref[0]
    K = jnp.dot(k2, wk_ref[...], preferred_element_type=jnp.float32) + bk_ref[0]
    V = jnp.dot(v2, wv_ref[...], preferred_element_type=jnp.float32) + bv_ref[0]

    _attention_tail(Q, K, V, wo_ref, bo_ref, out_ref, attn_ref,
                    n_heads=n_heads, head_dim=head_dim, compute_dtype=cd)


def mha_fused_qkv_kernel(x_ref, wqkv_ref, bqkv_ref, wo_ref, bo_ref,
                         out_ref, attn_ref, *, n_heads, head_dim, compute_dtype):
    """Self-attention fast path: one fused (rows, H) @ (H, 3H) projection."""
    b_blk, L, H = x_ref.shape
    rows = b_blk * L
    cd = compute_dtype

    x2 = x_ref[...].reshape(rows, H).astype(cd)
    QKV = jnp.dot(x2, wqkv_ref[...], preferred_element_type=jnp.float32) + bqkv_ref[0]
    Q = QKV[:, 0:H]
    K = QKV[:, H:2 * H]
    V = QKV[:, 2 * H:3 * H]

    _attention_tail(Q, K, V, wo_ref, bo_ref, out_ref, attn_ref,
                    n_heads=n_heads, head_dim=head_dim, compute_dtype=cd)


def _pick_batch_block(B, L, target_rows=256):
    """Largest divisor of B with b_blk*L <= target_rows; keep >=2 grid steps when possible
    so the batch-block axis can still shard across v7x's two TensorCores."""
    best = 1
    for c in range(1, B + 1):
        if B % c == 0 and c * L <= target_rows:
            best = c
    if B >= 2 and B // best < 2:
        divisors = [c for c in range(1, B // 2 + 1) if B % c == 0]
        if divisors:
            best = max(divisors)
    return best


def multi_head_attention(query, key, value, params, *, n_heads,
                         compute_dtype=jnp.float32, b_block=None,
                         attn_dtype=jnp.float32):
    """params: dict with wq,bq,wk,bk,wv,bv,wo,bo (weights [in,out], biases [1,H])."""
    B, L, H = query.shape
    assert H % n_heads == 0
    head_dim = H // n_heads

    if b_block is None:
        b_block = _pick_batch_block(B, L)
    assert B % b_block == 0
    grid_b = B // b_block
    cd = compute_dtype

    # Weights feed the MXU in compute_dtype (bf16 halves the weight DMA); biases stay fp32.
    wq = params["wq"].astype(cd); wk = params["wk"].astype(cd)
    wv = params["wv"].astype(cd); wo = params["wo"].astype(cd)
    bq = params["bq"].astype(jnp.float32); bk = params["bk"].astype(jnp.float32)
    bv = params["bv"].astype(jnp.float32); bo = params["bo"].astype(jnp.float32)

    seq_spec = pl.BlockSpec((b_block, L, H), lambda b: (b, 0, 0))
    out_specs = [
        pl.BlockSpec((b_block, L, H), lambda b: (b, 0, 0)),
        pl.BlockSpec((b_block, n_heads, L, L), lambda b: (b, 0, 0, 0)),
    ]
    out_shape = (
        jax.ShapeDtypeStruct((B, L, H), query.dtype),
        jax.ShapeDtypeStruct((B, n_heads, L, L), attn_dtype),
    )

    # Advisory cost estimate so XLA schedules neighboring ops around the custom call.
    flops = int(8 * B * L * H * H + 4 * B * n_heads * L * L * head_dim)
    transcendentals = int(B * n_heads * L * L)
    bytes_accessed = int(
        3 * B * L * H * query.dtype.itemsize                       # q, k, v
        + 4 * H * H * jnp.dtype(cd).itemsize + 4 * H * 4           # weights + biases
        + B * L * H * query.dtype.itemsize                         # out
        + B * n_heads * L * L * jnp.dtype(attn_dtype).itemsize)    # attention weights
    cost = pl.CostEstimate(flops=flops, transcendentals=transcendentals,
                           bytes_accessed=bytes_accessed)

    compiler_params = pltpu.CompilerParams(
        dimension_semantics=("parallel",),       # batch-block axis -> megacore-shardable
        vmem_limit_bytes=32 * 1024 * 1024,       # explicit budget; safe on v5e/v6e/v7x
    )
    # TODO(synk): for production-sized H/L, single-buffer the grid-invariant weight blocks and
    # tile L (flash-style streaming) instead of materializing (n_heads, L, L) per grid step.

    self_attention = (query is key) and (key is value)
    if self_attention:
        wqkv = jnp.concatenate([wq, wk, wv], axis=1)    # (H, 3H)
        bqkv = jnp.concatenate([bq, bk, bv], axis=1)    # (1, 3H)
        kernel = partial(mha_fused_qkv_kernel, n_heads=n_heads, head_dim=head_dim,
                         compute_dtype=cd)
        in_specs = [
            seq_spec,
            pl.BlockSpec((H, 3 * H), lambda b: (0, 0)),
            pl.BlockSpec((1, 3 * H), lambda b: (0, 0)),
            pl.BlockSpec((H, H), lambda b: (0, 0)),
            pl.BlockSpec((1, H), lambda b: (0, 0)),
        ]
        args = (query, wqkv, bqkv, wo, bo)
    else:
        kernel = partial(mha_kernel, n_heads=n_heads, head_dim=head_dim, compute_dtype=cd)
        weight_spec = pl.BlockSpec((H, H), lambda b: (0, 0))
        bias_spec = pl.BlockSpec((1, H), lambda b: (0, 0))
        in_specs = [seq_spec, seq_spec, seq_spec,
                    weight_spec, bias_spec, weight_spec, bias_spec,
                    weight_spec, bias_spec, weight_spec, bias_spec]
        args = (query, key, value, wq, bq, wk, bk, wv, bv, wo, bo)

    out, attn = pl.pallas_call(
        kernel,
        out_shape=out_shape,
        grid_spec=pltpu.PrefetchScalarGridSpec(
            num_scalar_prefetch=0,
            grid=(grid_b,),
            in_specs=in_specs,
            out_specs=out_specs),
        compiler_params=compiler_params,
        cost_estimate=cost,
    )(*args)
    return out, attn


def reference_mha(query, key, value, params, *, n_heads):
    """Pure-JAX reference mirroring the PyTorch forward (eval mode, mask=None)."""
    B, L, H = query.shape
    hd = H // n_heads
    Q = query @ params["wq"] + params["bq"][0]
    K = key @ params["wk"] + params["bk"][0]
    V = value @ params["wv"] + params["bv"][0]
    Q = Q.reshape(B, L, n_heads, hd).transpose(0, 2, 1, 3)
    K = K.reshape(B, L, n_heads, hd).transpose(0, 2, 1, 3)
    V = V.reshape(B, L, n_heads, hd).transpose(0, 2, 1, 3)
    energy = jnp.einsum("bhqd,bhkd->bhqk", Q, K) / math.sqrt(hd)
    attn = jax.nn.softmax(energy, axis=-1)
    x = jnp.einsum("bhqk,bhkd->bhqd", attn, V)
    x = x.transpose(0, 2, 1, 3).reshape(B, L, H)
    x = x @ params["wo"] + params["bo"][0]
    return x, attn


if __name__ == "__main__":
    B, L, H, NH = 2, 8, 32, 4
    dropout_ratio = 0.1   # dropout == identity at inference

    key = jax.random.PRNGKey(0)
    ks = jax.random.split(key, 12)

    def linear_params(kw, kb, fan_in, fan_out):
        bound = 1.0 / math.sqrt(fan_in)
        w = jax.random.uniform(kw, (fan_in, fan_out), jnp.float32, -bound, bound)  # [in, out]
        b = jax.random.uniform(kb, (1, fan_out), jnp.float32, -bound, bound)
        return w, b

    wq, bq = linear_params(ks[0], ks[1], H, H)
    wk, bk = linear_params(ks[2], ks[3], H, H)
    wv, bv = linear_params(ks[4], ks[5], H, H)
    wo, bo = linear_params(ks[6], ks[7], H, H)
    params = dict(wq=wq, bq=bq, wk=wk, bk=bk, wv=wv, bv=bv, wo=wo, bo=bo)

    query = jax.random.normal(ks[8], (B, L, H), jnp.float32)
    key_in = jax.random.normal(ks[9], (B, L, H), jnp.float32)
    value = jax.random.normal(ks[10], (B, L, H), jnp.float32)

    # 1) fp32, distinct q/k/v (cross-attention style): grid=(B,), batch axis parallel.
    out, attn = multi_head_attention(query, key_in, value, params, n_heads=NH)
    out = jax.block_until_ready(out)
    attn = jax.block_until_ready(attn)
    ref_out, ref_attn = reference_mha(query, key_in, value, params, n_heads=NH)
    assert out.shape == (B, L, H) and attn.shape == (B, NH, L, L)
    assert jnp.allclose(out, ref_out, atol=1e-3, rtol=1e-3), "fp32 output mismatch"
    assert jnp.allclose(attn, ref_attn, atol=1e-3, rtol=1e-3), "fp32 attention mismatch"

    # 2) fp32 self-attention (query is key is value) -> fused (H, 3H) QKV projection path.
    out_sa, attn_sa = multi_head_attention(query, query, query, params, n_heads=NH)
    out_sa = jax.block_until_ready(out_sa)
    ref_out_sa, ref_attn_sa = reference_mha(query, query, query, params, n_heads=NH)
    assert jnp.allclose(out_sa, ref_out_sa, atol=1e-3, rtol=1e-3), "fused-QKV output mismatch"
    assert jnp.allclose(attn_sa, ref_attn_sa, atol=1e-3, rtol=1e-3), "fused-QKV attention mismatch"

    # 3) bf16 MXU operands (fp32 accumulation/softmax), both batch elements in one grid step.
    out16, attn16 = multi_head_attention(query, key_in, value, params, n_heads=NH,
                                         compute_dtype=jnp.bfloat16, b_block=2)
    out16 = jax.block_until_ready(out16)
    assert jnp.allclose(out16, ref_out, atol=5e-2, rtol=5e-2), "bf16 output mismatch"
    assert jnp.allclose(attn16, ref_attn, atol=5e-2, rtol=5e-2), "bf16 attention mismatch"

    print("KERNEL_OK")
</pallas_src>

<mosaic_0001>
module attributes {stable_mosaic.version = 11 : i64} {
  func.func @mha_kernel(%arg0: i32, %arg1: memref<1x8x32xf32, #tpu.memory_space<vmem>>, %arg2: memref<1x8x32xf32, #tpu.memory_space<vmem>>, %arg3: memref<1x8x32xf32, #tpu.memory_space<vmem>>, %arg4: memref<32x32xf32, #tpu.memory_space<vmem>>, %arg5: memref<1x32xf32, #tpu.memory_space<vmem>>, %arg6: memref<32x32xf32, #tpu.memory_space<vmem>>, %arg7: memref<1x32xf32, #tpu.memory_space<vmem>>, %arg8: memref<32x32xf32, #tpu.memory_space<vmem>>, %arg9: memref<1x32xf32, #tpu.memory_space<vmem>>, %arg10: memref<32x32xf32, #tpu.memory_space<vmem>>, %arg11: memref<1x32xf32, #tpu.memory_space<vmem>>, %arg12: memref<1x8x32xf32, #tpu.memory_space<vmem>>, %arg13: memref<1x4x8x8xf32, #tpu.memory_space<vmem>>) attributes {dimension_semantics = [#tpu.dimension_semantics<parallel>], iteration_bounds = array<i64: 2>, scalar_prefetch = 0 : i64, scratch_operands = 0 : i64, tpu.core_type = #tpu.core_type<tc>, window_params = [{transform_indices = @transform_0, window_bounds = array<i64: 1, 8, 32>}, {transform_indices = @transform_1, window_bounds = array<i64: 1, 8, 32>}, {transform_indices = @transform_2, window_bounds = array<i64: 1, 8, 32>}, {pipeline_mode = #tpu.pipeline_mode<synchronous>, transform_indices = @transform_3, window_bounds = array<i64: 32, 32>}, {pipeline_mode = #tpu.pipeline_mode<synchronous>, transform_indices = @transform_4, window_bounds = array<i64: 1, 32>}, {pipeline_mode = #tpu.pipeline_mode<synchronous>, transform_indices = @transform_5, window_bounds = array<i64: 32, 32>}, {pipeline_mode = #tpu.pipeline_mode<synchronous>, transform_indices = @transform_6, window_bounds = array<i64: 1, 32>}, {pipeline_mode = #tpu.pipeline_mode<synchronous>, transform_indices = @transform_7, window_bounds = array<i64: 32, 32>}, {pipeline_mode = #tpu.pipeline_mode<synchronous>, transform_indices = @transform_8, window_bounds = array<i64: 1, 32>}, {pipeline_mode = #tpu.pipeline_mode<synchronous>, transform_indices = @transform_9, window_bounds = array<i64: 32, 32>}, {pipeline_mode = #tpu.pipeline_mode<synchronous>, transform_indices = @transform_10, window_bounds = array<i64: 1, 32>}, {transform_indices = @transform_11, window_bounds = array<i64: 1, 8, 32>}, {transform_indices = @transform_12, window_bounds = array<i64: 1, 4, 8, 8>}]} {
    %c0 = arith.constant 0 : index
    %c0_0 = arith.constant 0 : index
    %c0_1 = arith.constant 0 : index
    %0 = vector.load %arg1[%c0, %c0_0, %c0_1] : memref<1x8x32xf32, #tpu.memory_space<vmem>>, vector<1x8x32xf32>
    %1 = vector.shape_cast %0 : vector<1x8x32xf32> to vector<8x32xf32>
    %c0_2 = arith.constant 0 : index
    %c0_3 = arith.constant 0 : index
    %c0_4 = arith.constant 0 : index
    %2 = vector.load %arg2[%c0_2, %c0_3, %c0_4] : memref<1x8x32xf32, #tpu.memory_space<vmem>>, vector<1x8x32xf32>
    %3 = vector.shape_cast %2 : vector<1x8x32xf32> to vector<8x32xf32>
    %c0_5 = arith.constant 0 : index
    %c0_6 = arith.constant 0 : index
    %c0_7 = arith.constant 0 : index
    %4 = vector.load %arg3[%c0_5, %c0_6, %c0_7] : memref<1x8x32xf32, #tpu.memory_space<vmem>>, vector<1x8x32xf32>
    %5 = vector.shape_cast %4 : vector<1x8x32xf32> to vector<8x32xf32>
    %c0_8 = arith.constant 0 : index
    %c0_9 = arith.constant 0 : index
    %6 = vector.load %arg4[%c0_8, %c0_9] : memref<32x32xf32, #tpu.memory_space<vmem>>, vector<32x32xf32>
    %cst = arith.constant dense<0.000000e+00> : vector<8x32xf32>
    %7 = tpu.matmul %1, %6, %cst {dimension_numbers = #tpu.dot_dimension_numbers<[1], [0], [0], [1], [0, 0, 1, 1], [], []>} : vector<8x32xf32>, vector<32x32xf32>, vector<8x32xf32> -> vector<8x32xf32>
    %c0_10 = arith.constant 0 : index
    %c0_11 = arith.constant 0 : index
    %8 = vector.load %arg5[%c0_10, %c0_11] : memref<1x32xf32, #tpu.memory_space<vmem>>, vector<1x32xf32>
    %9 = vector.shape_cast %8 : vector<1x32xf32> to vector<32xf32>
    %10 = vector.shape_cast %9 : vector<32xf32> to vector<1x32xf32>
    %11 = vector.broadcast %10 : vector<1x32xf32> to vector<8x32xf32>
    %12 = arith.addf %7, %11 : vector<8x32xf32>
    %c0_12 = arith.constant 0 : index
    %c0_13 = arith.constant 0 : index
    %13 = vector.load %arg6[%c0_12, %c0_13] : memref<32x32xf32, #tpu.memory_space<vmem>>, vector<32x32xf32>
    %cst_14 = arith.constant dense<0.000000e+00> : vector<8x32xf32>
    %14 = tpu.matmul %3, %13, %cst_14 {dimension_numbers = #tpu.dot_dimension_numbers<[1], [0], [0], [1], [0, 0, 1, 1], [], []>} : vector<8x32xf32>, vector<32x32xf32>, vector<8x32xf32> -> vector<8x32xf32>
    %c0_15 = arith.constant 0 : index
    %c0_16 = arith.constant 0 : index
    %15 = vector.load %arg7[%c0_15, %c0_16] : memref<1x32xf32, #tpu.memory_space<vmem>>, vector<1x32xf32>
    %16 = vector.shape_cast %15 : vector<1x32xf32> to vector<32xf32>
    %17 = vector.shape_cast %16 : vector<32xf32> to vector<1x32xf32>
    %18 = vector.broadcast %17 : vector<1x32xf32> to vector<8x32xf32>
    %19 = arith.addf %14, %18 : vector<8x32xf32>
    %c0_17 = arith.constant 0 : index
    %c0_18 = arith.constant 0 : index
    %20 = vector.load %arg8[%c0_17, %c0_18] : memref<32x32xf32, #tpu.memory_space<vmem>>, vector<32x32xf32>
    %cst_19 = arith.constant dense<0.000000e+00> : vector<8x32xf32>
    %21 = tpu.matmul %5, %20, %cst_19 {dimension_numbers = #tpu.dot_dimension_numbers<[1], [0], [0], [1], [0, 0, 1, 1], [], []>} : vector<8x32xf32>, vector<32x32xf32>, vector<8x32xf32> -> vector<8x32xf32>
    %c0_20 = arith.constant 0 : index
    %c0_21 = arith.constant 0 : index
    %22 = vector.load %arg9[%c0_20, %c0_21] : memref<1x32xf32, #tpu.memory_space<vmem>>, vector<1x32xf32>
    %23 = vector.shape_cast %22 : vector<1x32xf32> to vector<32xf32>
    %24 = vector.shape_cast %23 : vector<32xf32> to vector<1x32xf32>
    %25 = vector.broadcast %24 : vector<1x32xf32> to vector<8x32xf32>
    %26 = arith.addf %21, %25 : vector<8x32xf32>
    %cst_22 = arith.constant 0.353553385 : f32
    %27 = vector.broadcast %cst_22 : f32 to vector<8x32xf32>
    %28 = arith.mulf %12, %27 : vector<8x32xf32>
    %29 = vector.shape_cast %28 : vector<8x32xf32> to vector<1x8x32xf32>
    %30 = vector.shape_cast %19 : vector<8x32xf32> to vector<1x8x32xf32>
    %31 = vector.shape_cast %26 : vector<8x32xf32> to vector<1x8x32xf32>
    %32 = vector.extract_strided_slice %29 {offsets = [0, 0, 0], sizes = [1, 8, 8], strides = [1, 1, 1]} : vector<1x8x32xf32> to vector<1x8x8xf32>
    %33 = vector.extract_strided_slice %30 {offsets = [0, 0, 0], sizes = [1, 8, 8], strides = [1, 1, 1]} : vector<1x8x32xf32> to vector<1x8x8xf32>
    %34 = vector.extract_strided_slice %31 {offsets = [0, 0, 0], sizes = [1, 8, 8], strides = [1, 1, 1]} : vector<1x8x32xf32> to vector<1x8x8xf32>
    "tpu.trace_start"() <{level = 10 : i32, message = "bqd,bkd->bqk"}> : () -> ()
    %cst_23 = arith.constant dense<0.000000e+00> : vector<1x8x8xf32>
    %35 = tpu.matmul %32, %33, %cst_23 {dimension_numbers = #tpu.dot_dimension_numbers<[2], [2], [1], [1], [0, 0, 0, 1, 1, 1], [0], [0]>} : vector<1x8x8xf32>, vector<1x8x8xf32>, vector<1x8x8xf32> -> vector<1x8x8xf32>
    "tpu.trace_stop"() : () -> ()
    %cst_24 = arith.constant dense<0xFF800000> : vector<1x8xf32>
    %36 = vector.multi_reduction <maximumf>, %35, %cst_24 [2] : vector<1x8x8xf32> to vector<1x8xf32>
    %37 = vector.shape_cast %36 : vector<1x8xf32> to vector<1x8x1xf32>
    %38 = vector.broadcast %37 : vector<1x8x1xf32> to vector<1x8x8xf32>
    %39 = arith.subf %35, %38 : vector<1x8x8xf32>
    %40 = math.exp %39 : vector<1x8x8xf32>
    %cst_25 = arith.constant dense<0.000000e+00> : vector<1x8xf32>
    %41 = vector.multi_reduction <add>, %40, %cst_25 [2] : vector<1x8x8xf32> to vector<1x8xf32>
    %42 = vector.shape_cast %41 : vector<1x8xf32> to vector<1x8x1xf32>
    %43 = tpu.reciprocal %42 {approx = true} : vector<1x8x1xf32> -> vector<1x8x1xf32>
    %44 = arith.mulf %42, %43 : vector<1x8x1xf32>
    %cst_26 = arith.constant 2.000000e+00 : f32
    %45 = vector.broadcast %cst_26 : f32 to vector<1x8x1xf32>
    %46 = arith.subf %45, %44 : vector<1x8x1xf32>
    %47 = arith.mulf %43, %46 : vector<1x8x1xf32>
    %48 = vector.broadcast %47 : vector<1x8x1xf32> to vector<1x8x8xf32>
    %49 = arith.mulf %40, %48 : vector<1x8x8xf32>
    %50 = vector.shape_cast %49 : vector<1x8x8xf32> to vector<1x1x8x8xf32>
    "tpu.trace_start"() <{level = 10 : i32, message = "bqk,bkd->bqd"}> : () -> ()
    %cst_27 = arith.constant dense<0.000000e+00> : vector<1x8x8xf32>
    %51 = tpu.matmul %49, %34, %cst_27 {dimension_numbers = #tpu.dot_dimension_numbers<[2], [1], [1], [2], [0, 0, 0, 1, 1, 2], [0], [0]>} : vector<1x8x8xf32>, vector<1x8x8xf32>, vector<1x8x8xf32> -> vector<1x8x8xf32>
    "tpu.trace_stop"() : () -> ()
    %52 = vector.extract_strided_slice %29 {offsets = [0, 0, 8], sizes = [1, 8, 8], strides = [1, 1, 1]} : vector<1x8x32xf32> to vector<1x8x8xf32>
    %53 = vector.extract_strided_slice %30 {offsets = [0, 0, 8], sizes = [1, 8, 8], strides = [1, 1, 1]} : vector<1x8x32xf32> to vector<1x8x8xf32>
    %54 = vector.extract_strided_slice %31 {offsets = [0, 0, 8], sizes = [1, 8, 8], strides = [1, 1, 1]} : vector<1x8x32xf32> to vector<1x8x8xf32>
    "tpu.trace_start"() <{level = 10 : i32, message = "bqd,bkd->bqk"}> : () -> ()
    %cst_28 = arith.constant dense<0.000000e+00> : vector<1x8x8xf32>
    %55 = tpu.matmul %52, %53, %cst_28 {dimension_numbers = #tpu.dot_dimension_numbers<[2], [2], [1], [1], [0, 0, 0, 1, 1, 1], [0], [0]>} : vector<1x8x8xf32>, vector<1x8x8xf32>, vector<1x8x8xf32> -> vector<1x8x8xf32>
    "tpu.trace_stop"() : () -> ()
    %cst_29 = arith.constant dense<0xFF800000> : vector<1x8xf32>
    %56 = vector.multi_reduction <maximumf>, %55, %cst_29 [2] : vector<1x8x8xf32> to vector<1x8xf32>
    %57 = vector.shape_cast %56 : vector<1x8xf32> to vector<1x8x1xf32>
    %58 = vector.broadcast %57 : vector<1x8x1xf32> to vector<1x8x8xf32>
    %59 = arith.subf %55, %58 : vector<1x8x8xf32>
    %60 = math.exp %59 : vector<1x8x8xf32>
    %cst_30 = arith.constant dense<0.000000e+00> : vector<1x8xf32>
    %61 = vector.multi_reduction <add>, %60, %cst_30 [2] : vector<1x8x8xf32> to vector<1x8xf32>
    %62 = vector.shape_cast %61 : vector<1x8xf32> to vector<1x8x1xf32>
    %63 = tpu.reciprocal %62 {approx = true} : vector<1x8x1xf32> -> vector<1x8x1xf32>
    %64 = arith.mulf %62, %63 : vector<1x8x1xf32>
    %cst_31 = arith.constant 2.000000e+00 : f32
    %65 = vector.broadcast %cst_31 : f32 to vector<1x8x1xf32>
    %66 = arith.subf %65, %64 : vector<1x8x1xf32>
    %67 = arith.mulf %63, %66 : vector<1x8x1xf32>
    %68 = vector.broadcast %67 : vector<1x8x1xf32> to vector<1x8x8xf32>
    %69 = arith.mulf %60, %68 : vector<1x8x8xf32>
    %70 = vector.shape_cast %69 : vector<1x8x8xf32> to vector<1x1x8x8xf32>
    "tpu.trace_start"() <{level = 10 : i32, message = "bqk,bkd->bqd"}> : () -> ()
    %cst_32 = arith.constant dense<0.000000e+00> : vector<1x8x8xf32>
    %71 = tpu.matmul %69, %54, %cst_32 {dimension_numbers = #tpu.dot_dimension_numbers<[2], [1], [1], [2], [0, 0, 0, 1, 1, 2], [0], [0]>} : vector<1x8x8xf32>, vector<1x8x8xf32>, vector<1x8x8xf32> -> vector<1x8x8xf32>
    "tpu.trace_stop"() : () -> ()
    %72 = vector.extract_strided_slice %29 {offsets = [0, 0, 16], sizes = [1, 8, 8], strides = [1, 1, 1]} : vector<1x8x32xf32> to vector<1x8x8xf32>
    %73 = vector.extract_strided_slice %30 {offsets = [0, 0, 16], sizes = [1, 8, 8], strides = [1, 1, 1]} : vector<1x8x32xf32> to vector<1x8x8xf32>
    %74 = vector.extract_strided_slice %31 {offsets = [0, 0, 16], sizes = [1, 8, 8], strides = [1, 1, 1]} : vector<1x8x32xf32> to vector<1x8x8xf32>
    "tpu.trace_start"() <{level = 10 : i32, message = "bqd,bkd->bqk"}> : () -> ()
    %cst_33 = arith.constant dense<0.000000e+00> : vector<1x8x8xf32>
    %75 = tpu.matmul %72, %73, %cst_33 {dimension_numbers = #tpu.dot_dimension_numbers<[2], [2], [1], [1], [0, 0, 0, 1, 1, 1], [0], [0]>} : vector<1x8x8xf32>, vector<1x8x8xf32>, vector<1x8x8xf32> -> vector<1x8x8xf32>
    "tpu.trace_stop"() : () -> ()
    %cst_34 = arith.constant dense<0xFF800000> : vector<1x8xf32>
    %76 = vector.multi_reduction <maximumf>, %75, %cst_34 [2] : vector<1x8x8xf32> to vector<1x8xf32>
    %77 = vector.shape_cast %76 : vector<1x8xf32> to vector<1x8x1xf32>
    %78 = vector.broadcast %77 : vector<1x8x1xf32> to vector<1x8x8xf32>
    %79 = arith.subf %75, %78 : vector<1x8x8xf32>
    %80 = math.exp %79 : vector<1x8x8xf32>
    %cst_35 = arith.constant dense<0.000000e+00> : vector<1x8xf32>
    %81 = vector.multi_reduction <add>, %80, %cst_35 [2] : vector<1x8x8xf32> to vector<1x8xf32>
    %82 = vector.shape_cast %81 : vector<1x8xf32> to vector<1x8x1xf32>
    %83 = tpu.reciprocal %82 {approx = true} : vector<1x8x1xf32> -> vector<1x8x1xf32>
    %84 = arith.mulf %82, %83 : vector<1x8x1xf32>
    %cst_36 = arith.constant 2.000000e+00 : f32
    %85 = vector.broadcast %cst_36 : f32 to vector<1x8x1xf32>
    %86 = arith.subf %85, %84 : vector<1x8x1xf32>
    %87 = arith.mulf %83, %86 : vector<1x8x1xf32>
    %88 = vector.broadcast %87 : vector<1x8x1xf32> to vector<1x8x8xf32>
    %89 = arith.mulf %80, %88 : vector<1x8x8xf32>
    %90 = vector.shape_cast %89 : vector<1x8x8xf32> to vector<1x1x8x8xf32>
    "tpu.trace_start"() <{level = 10 : i32, message = "bqk,bkd->bqd"}> : () -> ()
    %cst_37 = arith.constant dense<0.000000e+00> : vector<1x8x8xf32>
    %91 = tpu.matmul %89, %74, %cst_37 {dimension_numbers = #tpu.dot_dimension_numbers<[2], [1], [1], [2], [0, 0, 0, 1, 1, 2], [0], [0]>} : vector<1x8x8xf32>, vector<1x8x8xf32>, vector<1x8x8xf32> -> vector<1x8x8xf32>
    "tpu.trace_stop"() : () -> ()
    %92 = vector.extract_strided_slice %29 {offsets = [0, 0, 24], sizes = [1, 8, 8], strides = [1, 1, 1]} : vector<1x8x32xf32> to vector<1x8x8xf32>
    %93 = vector.extract_strided_slice %30 {offsets = [0, 0, 24], sizes = [1, 8, 8], strides = [1, 1, 1]} : vector<1x8x32xf32> to vector<1x8x8xf32>
    %94 = vector.extract_strided_slice %31 {offsets = [0, 0, 24], sizes = [1, 8, 8], strides = [1, 1, 1]} : vector<1x8x32xf32> to vector<1x8x8xf32>
    "tpu.trace_start"() <{level = 10 : i32, message = "bqd,bkd->bqk"}> : () -> ()
    %cst_38 = arith.constant dense<0.000000e+00> : vector<1x8x8xf32>
    %95 = tpu.matmul %92, %93, %cst_38 {dimension_numbers = #tpu.dot_dimension_numbers<[2], [2], [1], [1], [0, 0, 0, 1, 1, 1], [0], [0]>} : vector<1x8x8xf32>, vector<1x8x8xf32>, vector<1x8x8xf32> -> vector<1x8x8xf32>
    "tpu.trace_stop"() : () -> ()
    %cst_39 = arith.constant dense<0xFF800000> : vector<1x8xf32>
    %96 = vector.multi_reduction <maximumf>, %95, %cst_39 [2] : vector<1x8x8xf32> to vector<1x8xf32>
    %97 = vector.shape_cast %96 : vector<1x8xf32> to vector<1x8x1xf32>
    %98 = vector.broadcast %97 : vector<1x8x1xf32> to vector<1x8x8xf32>
    %99 = arith.subf %95, %98 : vector<1x8x8xf32>
    %100 = math.exp %99 : vector<1x8x8xf32>
    %cst_40 = arith.constant dense<0.000000e+00> : vector<1x8xf32>
    %101 = vector.multi_reduction <add>, %100, %cst_40 [2] : vector<1x8x8xf32> to vector<1x8xf32>
    %102 = vector.shape_cast %101 : vector<1x8xf32> to vector<1x8x1xf32>
    %103 = tpu.reciprocal %102 {approx = true} : vector<1x8x1xf32> -> vector<1x8x1xf32>
    %104 = arith.mulf %102, %103 : vector<1x8x1xf32>
    %cst_41 = arith.constant 2.000000e+00 : f32
    %105 = vector.broadcast %cst_41 : f32 to vector<1x8x1xf32>
    %106 = arith.subf %105, %104 : vector<1x8x1xf32>
    %107 = arith.mulf %103, %106 : vector<1x8x1xf32>
    %108 = vector.broadcast %107 : vector<1x8x1xf32> to vector<1x8x8xf32>
    %109 = arith.mulf %100, %108 : vector<1x8x8xf32>
    %110 = vector.shape_cast %109 : vector<1x8x8xf32> to vector<1x1x8x8xf32>
    "tpu.trace_start"() <{level = 10 : i32, message = "bqk,bkd->bqd"}> : () -> ()
    %cst_42 = arith.constant dense<0.000000e+00> : vector<1x8x8xf32>
    %111 = tpu.matmul %109, %94, %cst_42 {dimension_numbers = #tpu.dot_dimension_numbers<[2], [1], [1], [2], [0, 0, 0, 1, 1, 2], [0], [0]>} : vector<1x8x8xf32>, vector<1x8x8xf32>, vector<1x8x8xf32> -> vector<1x8x8xf32>
    "tpu.trace_stop"() : () -> ()
    %112 = tpu.concatenate %50, %70, %90, %110 in 1 : vector<1x1x8x8xf32>, vector<1x1x8x8xf32>, vector<1x1x8x8xf32>, vector<1x1x8x8xf32> -> vector<1x4x8x8xf32>
    %c0_43 = arith.constant 0 : index
    %c0_44 = arith.constant 0 : index
    %c0_45 = arith.constant 0 : index
    %c0_46 = arith.constant 0 : index
    %113 = vector.load %arg13[%c0_43, %c0_44, %c0_45, %c0_46] : memref<1x4x8x8xf32, #tpu.memory_space<vmem>>, vector<1x4x8x8xf32>
    tpu.vector_store %arg13[%c0_43, %c0_44, %c0_45, %c0_46], %112 {strides = array<i32>} : memref<1x4x8x8xf32, #tpu.memory_space<vmem>>, vector<1x4x8x8xf32>,
    %114 = tpu.concatenate %51, %71, %91, %111 in 2 : vector<1x8x8xf32>, vector<1x8x8xf32>, vector<1x8x8xf32>, vector<1x8x8xf32> -> vector<1x8x32xf32>
    %115 = vector.shape_cast %114 : vector<1x8x32xf32> to vector<8x32xf32>
    %c0_47 = arith.constant 0 : index
    %c0_48 = arith.constant 0 : index
    %116 = vector.load %arg10[%c0_47, %c0_48] : memref<32x32xf32, #tpu.memory_space<vmem>>, vector<32x32xf32>
    %cst_49 = arith.constant dense<0.000000e+00> : vector<8x32xf32>
    %117 = tpu.matmul %115, %116, %cst_49 {dimension_numbers = #tpu.dot_dimension_numbers<[1], [0], [0], [1], [0, 0, 1, 1], [], []>} : vector<8x32xf32>, vector<32x32xf32>, vector<8x32xf32> -> vector<8x32xf32>
    %c0_50 = arith.constant 0 : index
    %c0_51 = arith.constant 0 : index
    %118 = vector.load %arg11[%c0_50, %c0_51] : memref<1x32xf32, #tpu.memory_space<vmem>>, vector<1x32xf32>
    %119 = vector.shape_cast %118 : vector<1x32xf32> to vector<32xf32>
    %120 = vector.shape_cast %119 : vector<32xf32> to vector<1x32xf32>
    %121 = vector.broadcast %120 : vector<1x32xf32> to vector<8x32xf32>
    %122 = arith.addf %117, %121 : vector<8x32xf32>
    %123 = vector.shape_cast %122 : vector<8x32xf32> to vector<1x8x32xf32>
    %c0_52 = arith.constant 0 : index
    %c0_53 = arith.constant 0 : index
    %c0_54 = arith.constant 0 : index
    %124 = vector.load %arg12[%c0_52, %c0_53, %c0_54] : memref<1x8x32xf32, #tpu.memory_space<vmem>>, vector<1x8x32xf32>
    tpu.vector_store %arg12[%c0_52, %c0_53, %c0_54], %123 {strides = array<i32>} : memref<1x8x32xf32, #tpu.memory_space<vmem>>, vector<1x8x32xf32>,
    return
  }
  func.func @transform_0(%arg0: i32) -> (i32, i32, i32) {
    %c0_i32 = arith.constant 0 : i32
    %c0_i32_0 = arith.constant 0 : i32
    %c0_i32_1 = arith.constant 0 : i32
    return %arg0, %c0_i32, %c0_i32_0 : i32, i32, i32
  }
  func.func @transform_1(%arg0: i32) -> (i32, i32, i32) {
    %c0_i32 = arith.constant 0 : i32
    %c0_i32_0 = arith.constant 0 : i32
    %c0_i32_1 = arith.constant 0 : i32
    return %arg0, %c0_i32, %c0_i32_0 : i32, i32, i32
  }
  func.func @transform_2(%arg0: i32) -> (i32, i32, i32) {
    %c0_i32 = arith.constant 0 : i32
    %c0_i32_0 = arith.constant 0 : i32
    %c0_i32_1 = arith.constant 0 : i32
    return %arg0, %c0_i32, %c0_i32_0 : i32, i32, i32
  }
  func.func @transform_3(%arg0: i32) -> (i32, i32) {
    %c0_i32 = arith.constant 0 : i32
    %c0_i32_0 = arith.constant 0 : i32
    %c0_i32_1 = arith.constant 0 : i32
    return %c0_i32, %c0_i32_0 : i32, i32
  }
  func.func @transform_4(%arg0: i32) -> (i32, i32) {
    %c0_i32 = arith.constant 0 : i32
    %c0_i32_0 = arith.constant 0 : i32
    %c0_i32_1 = arith.constant 0 : i32
    return %c0_i32, %c0_i32_0 : i32, i32
  }
  func.func @transform_5(%arg0: i32) -> (i32, i32) {
    %c0_i32 = arith.constant 0 : i32
    %c0_i32_0 = arith.constant 0 : i32
    %c0_i32_1 = arith.constant 0 : i32
    return %c0_i32, %c0_i32_0 : i32, i32
  }
  func.func @transform_6(%arg0: i32) -> (i32, i32) {
    %c0_i32 = arith.constant 0 : i32
    %c0_i32_0 = arith.constant 0 : i32
    %c0_i32_1 = arith.constant 0 : i32
    return %c0_i32, %c0_i32_0 : i32, i32
  }
  func.func @transform_7(%arg0: i32) -> (i32, i32) {
    %c0_i32 = arith.constant 0 : i32
    %c0_i32_0 = arith.constant 0 : i32
    %c0_i32_1 = arith.constant 0 : i32
    return %c0_i32, %c0_i32_0 : i32, i32
  }
  func.func @transform_8(%arg0: i32) -> (i32, i32) {
    %c0_i32 = arith.constant 0 : i32
    %c0_i32_0 = arith.constant 0 : i32
    %c0_i32_1 = arith.constant 0 : i32
    return %c0_i32, %c0_i32_0 : i32, i32
  }
  func.func @transform_9(%arg0: i32) -> (i32, i32) {
    %c0_i32 = arith.constant 0 : i32
    %c0_i32_0 = arith.constant 0 : i32
    %c0_i32_1 = arith.constant 0 : i32
    return %c0_i32, %c0_i32_0 : i32, i32
  }
  func.func @transform_10(%arg0: i32) -> (i32, i32) {
    %c0_i32 = arith.constant 0 : i32
    %c0_i32_0 = arith.constant 0 : i32
    %c0_i32_1 = arith.constant 0 : i32
    return %c0_i32, %c0_i32_0 : i32, i32
  }
  func.func @transform_11(%arg0: i32) -> (i32, i32, i32) {
    %c0_i32 = arith.constant 0 : i32
    %c0_i32_0 = arith.constant 0 : i32
    %c0_i32_1 = arith.constant 0 : i32
    return %arg0, %c0_i32, %c0_i32_0 : i32, i32, i32
  }
  func.func @transform_12(%arg0: i32) -> (i32, i32, i32, i32) {
    %c0_i32 = arith.constant 0 : i32
    %c0_i32_0 = arith.constant 0 : i32
    %c0_i32_1 = arith.constant 0 : i32
    %c0_i32_2 = arith.constant 0 : i32
    return %arg0, %c0_i32, %c0_i32_0, %c0_i32_1 : i32, i32, i32, i32
  }
}

</mosaic_0001>

<bundles_post_ra>
// kernel: tpu_custom_call.1
= control target key start
LH: loop header
LB: loop body
LE: loop exit
PB: predicated region body
PF: predicated region fallthrough
CT: control target
= control target key end

     0   :  { %s3054_s0 = inlined_call_operand.hbm [shape: f32[2,8,32], index: 0, kind: input, shape index: {}]   ;;  %s3055_s1 = inlined_call_operand.hbm [shape: f32[2,8,32], index: 1, kind: input, shape index: {}]   ;;  %s3056_s2 = inlined_call_operand.hbm [shape: f32[2,8,32], index: 2, kind: input, shape index: {}]   ;;  %s3057_s3 = inlined_call_operand.hbm [shape: f32[32,32], index: 3, kind: input, shape index: {}]   ;;  %s3058_s4 = inlined_call_operand.vmem [shape: f32[1,32], index: 4, kind: input, shape index: {}]   ;;  %s3059_s5 = inlined_call_operand.hbm [shape: f32[32,32], index: 5, kind: input, shape index: {}]   ;;  %s3060_s6 = inlined_call_operand.vmem [shape: f32[1,32], index: 6, kind: input, shape index: {}]   ;;  %s3061_s7 = inlined_call_operand.hbm [shape: f32[32,32], index: 7, kind: input, shape index: {}]   ;;  %s3062_s8 = inlined_call_operand.hbm [shape: f32[1,32], index: 8, kind: input, shape index: {}]   ;;  %s3063_s9 = inlined_call_operand.vmem [shape: f32[32,32], index: 9, kind: input, shape index: {}]   ;;  %s3064_s10 = inlined_call_operand.vmem [shape: f32[1,32], index: 10, kind: input, shape index: {}]   ;;  %s3065_s11 = inlined_call_operand.hbm [shape: f32[2,8,32], index: 11, kind: output, shape index: {0}]   ;;  %s3066_s12 = inlined_call_operand.hbm [shape: f32[2,4,8,8], index: 12, kind: output, shape index: {1}]  }
   0x1   :  { %3092 = sst [smem:[#allocation29_spill]] %s3055_s1 }
   0x2   :  { %3093 = sst [smem:[#allocation30_spill]] %s3057_s3 }
   0x3   :  { %3094 = sst [smem:[#allocation31_spill]] %s3058_s4 }
   0x4   :  { %3095 = sst [smem:[#allocation32_spill]] %s3061_s7 }
   0x5   :  { %3096 = sst [smem:[#allocation33_spill]] %s3063_s9 }
   0x6   :  { %3097 = sst [smem:[#allocation34_spill]] %s3064_s10 }
   0x7   :  { %3098 = sst [smem:[#allocation35_spill]] %s3065_s11 }
   0x8   :  { %3099 = sst [smem:[#allocation36_spill]] %s3066_s12 }
   0x9   :  { %18 = vsyncpa [#allocation3], 0 }
   0xa   :  { %20 = vsyncpa [#allocation3 + $0x1], 0 }
   0xb   :  { %21 = vsyncpa [#allocation6], 0 }
   0xc   :  { %23 = vsyncpa [#allocation6 + $0x1], 0 }
   0xd   :  { %24 = vsyncpa [#allocation9], 0 }
   0xe   :  { %25 = vsyncpa [#allocation12], 0 }
   0xf   :  { %26 = vsyncpa [#allocation4], 0 }
  0x10   :  { %28 = vsyncpa [#allocation4 + $0x1], 0 }
  0x11   :  { %29 = vsyncpa [#allocation16], 0 }
  0x12   :  { %31 = vsyncpa [#allocation16 + $0x1], 0  ;;  %s2542_s21 = smov 0   ;;  %s2544_s22 = smov 0  }
  0x13   :  { %s2546_s23 = smov 0   ;;  %s2548_s24 = smov 0  }
  0x14 LB: > { %3100 = sst [smem:[#allocation23_spill]] %s2442_s21  ;;  %s2456_s25 = smov [#allocation8]   ;;  %s2454_s24 = sphi %s2548_s24, %s3143_s24   ;;  %s2450_s23 = sphi %s2546_s23, %s3147_s23   ;;  %s2446_s22 = sphi %s2544_s22, %s3146_s22   ;;  %s2442_s21 = sphi %s2542_s21, %s3145_s21  }
  0x15   : > { %3101 = sst [smem:[#allocation24_spill]] %s2454_s24  ;;  %s352_s26 = sshll.u32 %s2456_s25, 4  ;;  %s2568_s26 = int_to_ptr.vmem [resolvable:$true] %s352_s26 }
  0x16   : > { %s2563_s27 = sadd.s32 4294967295, %s2454_s24   ;;  %p1818_p0 = scmp.ge.s32.totalorder %s2454_s24, 1 }
  0x17   : > { %p3078_p1 = scmp.eq.s32.totalorder %s2563_s27, 0  ;;  %p340_p2 = scmp.lt.s32.totalorder %s2454_s24, 3 }
  0x18   : > { %s2457_s29 = smov [#allocation11]   ;;  %s3104_s3 = sld [smem:[#allocation30_spill]] }
  0x19   : > { %p2570_p3 = pnand %p1818_p0, %p340_p2  ;;  %s384_s30 = sshll.u32 %s2457_s29, 4  ;;  %s2583_s30 = int_to_ptr.vmem [resolvable:$true] %s384_s30 }
  0x1b   : > { %s3102_s28 = scalar_select %p2570_p3, 1, 0 }
  0x1c   : > { %p2038_p5 = pneg %p2570_p3 }
  0x1e   : > { %p2579_p6 = pnand %p2038_p5, %p3078_p1  ;;  %s2142_s16 = scalar_lea.hbm %s3104_s3, 512 }
  0x1f   : > { %p2143_p7 = scmp.ne.s32.totalorder %s3104_s3, %s2142_s16  ;;  %p2149_p11 = scmp.lt.u32.totalorder %s2142_s16, %s3104_s3 }
  0x20   : > { %s3103_s13 = scalar_select %p2579_p6, 1, 0 }
  0x21   : > { %p2593_p8 = pneg %p2579_p6 }
  0x23   : > { %s3105_s19 = scalar_select %p2593_p8, 1, 0 }
  0x24   : > { %p2145_p9 = pnand %p2593_p8, %p2143_p7 }
  0x26   : > { %p2146_p10 = pneg %p2145_p9 }
  0x28   : > { %p2151_p12 = pnand %p2149_p11, %p2146_p10 }
  0x2a   : > { %2154 = shalt.err (!%p2151_p12)
}
  0x2b   : > { %s2155_s29 = scalar_lea.vmem %s2568_s26, 512  ;;  %p2163_p5 = scmp.lt.s32.totalorder %s2568_s26, %s2568_s26 }
  0x2c   : > { %p2156_p13 = scmp.ne.s32.totalorder %s2568_s26, %s2155_s29  ;;  %p2164_p4 = scmp.lt.s32.totalorder %s2155_s29, %s2155_s29 }
  0x2e   : > { %p2158_p0 = pnand %p2156_p13, %p2593_p8  ;;  %p2165_p7 = por %p2164_p4, %p2163_p5 }
  0x30   : > { %p2159_p2 = pneg %p2158_p0 }
  0x32   : > { %p2166_p9 = pnand %p2165_p7, %p2159_p2 }
  0x34   : > { %2169 = shalt.err (!%p2166_p9)
}
  0x35   : > { %s3070_s14 = smov 128   ;;  %s3071_s15 = smov 8  }
  0x36   : > { %2041 = dma.hbm_to_vmem [thread:$0]  (!%p2579_p6), %s3104_s3, 512, %s2568_s26, [#allocation9], %s3070_s14, %s3070_s14, %s3071_s15  }
  0x37   : > { %s3106_s7 = sld [smem:[#allocation32_spill]] }
  0x3d   : > { %s2170_s25 = scalar_lea.hbm %s3106_s7, 512 }
  0x3e   : > { %p2171_p4 = scmp.ne.s32.totalorder %s3106_s7, %s2170_s25  ;;  %p2177_p12 = scmp.lt.u32.totalorder %s2170_s25, %s3106_s7 }
  0x40   : > { %p2173_p10 = pnand %p2171_p4, %p2593_p8 }
  0x42   : > { %p2174_p11 = pneg %p2173_p10 }
  0x44   : > { %p2179_p13 = pnand %p2177_p12, %p2174_p11 }
  0x46   : > { %2182 = shalt.err (!%p2179_p13)
}
  0x47   : > { %s2183_s26 = scalar_lea.vmem %s2583_s30, 512  ;;  %p2191_p7 = scmp.lt.s32.totalorder %s2583_s30, %s2583_s30 }
  0x48   : > { %p2184_p0 = scmp.ne.s32.totalorder %s2583_s30, %s2183_s26  ;;  %p2192_p9 = scmp.lt.s32.totalorder %s2183_s26, %s2183_s26 }
  0x4a   : > { %p2186_p2 = pnand %p2184_p0, %p2593_p8  ;;  %p2193_p4 = por %p2192_p9, %p2191_p7 }
  0x4c   : > { %p2187_p5 = pneg %p2186_p2 }
  0x4e   : > { %p2194_p10 = pnand %p2193_p4, %p2187_p5 }
  0x50   : > { %2197 = shalt.err (!%p2194_p10)
}
  0x51   : > { %2047 = dma.hbm_to_vmem [thread:$0]  (!%p2579_p6), %s3106_s7, 512, %s2583_s30, [#allocation12], %s3070_s14, %s3070_s14, %s3071_s15  }
  0x52   : > { %s1817_s12 = sadd.s32 4294967294, %s2454_s24   ;;  %s2645_s16 = sadd.s32 1, %s2454_s24  }
  0x53   : > { %3107 = sst [smem:[#allocation25_spill]] %s2645_s16  ;;  %s41_s17 = ssub.s32 %s2454_s24, %s2645_s16 }
  0x54   : > { %s44_s18 = sadd.s32 1, %s2450_s23  ;;  %p42_p11 = scmp.eq.s32.totalorder %s41_s17, 0 }
  0x55   : > { %p51_p12 = scmp.ne.s32.totalorder %s2450_s23, %s2446_s22  ;;  %p52_p13 = scmp.eq.s32.totalorder %s2454_s24, 0 }
  0x56   : > { %p57_p0 = scmp.ne.s32.totalorder %s2446_s22, %s2442_s21  ;;  %p301_p7 = scmp.eq.s32.totalorder %s2563_s27, 1 }
  0x57   : > { %s2656_s20 = scalar_select %p42_p11, %s2450_s23, %s44_s18  }
  0x58   : > { %p53_p2 = por %p52_p13, %p51_p12  ;;  %p2660_p5 = por %p3078_p1, %p57_p0 }
  0x59   : > { %3108 = sst [smem:[#allocation26_spill]] %s2656_s20  ;;  %p307_p9 = scmp.eq.s32.totalorder %s1817_s12, 1 }
  0x5a   : > { %s3109_s25 = scalar_select %p2660_p5, 1, 0 }
  0x5b   : > { %p2072_p4 = scmp.lt.s32.totalorder %s2454_s24, 2  ;;  %s3072_s30 = sand.u32 1, %s2450_s23  }
  0x5c   : > { %p2667_p10 = por %p301_p7, %p51_p12  ;;  %p2671_p3 = por %p307_p9, %p57_p0 }
  0x5d   : > { %s2677_s10 = sshll.u32 %s3072_s30, 3  ;;  %s2680_s11 = sshll.u32 %s2454_s24, 7 }
  0x5e   : > { %s3110_s29 = scalar_select %p2667_p10, 1, 0 }
  0x5f   : > { %s3112_s26 = scalar_select %p2671_p3, 1, 0 }
  0x60   : > { %3111 = sst [smem:[#allocation27_spill]] %s3110_s29  ;;  %p2682_p11 = pnand %p2072_p4, %p53_p2 }
  0x61   : > { %3113 = sst [smem:[#allocation28_spill]] %s3112_s26  ;;  %s433_s12 = sand.u32 1, %s2454_s24  }
  0x62   : > { %s3114_s17 = scalar_select %p2682_p11, 1, 0 }
  0x63   : > { %s3115_s1 = sld [smem:[#allocation29_spill]]  ;;  %s437_s30 = scalar_lea.vmem [#allocation5], %s2677_s10 }
  0x64   : > { %s444_s3 = sshll.u32 %s437_s30, 4  ;;  %s2460_s7 = smov [#allocation10]   ;;  %s2694_s3 = int_to_ptr.vmem [resolvable:$true] %s444_s3 }
  0x65   : > { %s2696_s20 = sshll.u32 %s2460_s7, 4  ;;  %s2698_s16 = scalar_lea.sflag [#allocation6], %s433_s12  ;;  %s369_s20 = int_to_ptr.vmem [resolvable:$true] %s2696_s20 }
  0x66   : > { %p2704_p13 = pneg %p2682_p11 }
  0x68   : > { %s3116_s14 = scalar_select %p2704_p13, 1, 0 }
  0x69   : > { %s2691_s15 = scalar_lea.hbm %s3115_s1, %s2680_s11  ;;  %s2203_s24 = scalar_lea.hbm %s3115_s1, 256 }
  0x6a   : > { %s2198_s26 = scalar_lea.hbm %s2691_s15, 128  ;;  %p2204_p7 = scmp.lt.u32.totalorder %s2691_s15, %s3115_s1 }
  0x6b   : > { %p2199_p12 = scmp.ne.s32.totalorder %s2691_s15, %s2198_s26  ;;  %p2205_p9 = scmp.lt.u32.totalorder %s2203_s24, %s2198_s26 }
  0x6c   : > { %p2207_p1 = scmp.lt.u32.totalorder %s2198_s26, %s2691_s15 }
  0x6d   : > { %p2201_p0 = pnand %p2704_p13, %p2199_p12  ;;  %p2206_p4 = por %p2205_p9, %p2204_p7 }
  0x6f   : > { %p2202_p2 = pneg %p2201_p0  ;;  %p2208_p3 = por %p2207_p1, %p2206_p4 }
  0x71   : > { %p2209_p10 = pnand %p2208_p3, %p2202_p2 }
  0x73   : > { %2212 = shalt.err (!%p2209_p10)
}
  0x74   : > { %s2213_s12 = scalar_lea.vmem %s2694_s3, 128  ;;  %s2461_s18 = smov [#allocation5]  }
  0x75   : > { %p2214_p12 = scmp.ne.s32.totalorder %s2694_s3, %s2213_s12  ;;  %s2218_s30 = sshll.u32 %s2461_s18, 4  ;;  %s2219_s30 = int_to_ptr.vmem [resolvable:$false] %s2218_s30 }
  0x76   : > { %s2220_s21 = scalar_lea.vmem %s2219_s30, 256  ;;  %p2221_p6 = scmp.lt.s32.totalorder %s2694_s3, %s2219_s30 }
  0x77   : > { %p2216_p0 = pnand %p2214_p12, %p2704_p13  ;;  %p2222_p8 = scmp.lt.s32.totalorder %s2220_s21, %s2213_s12 }
  0x79   : > { %p2217_p5 = pneg %p2216_p0  ;;  %p2223_p7 = por %p2222_p8, %p2221_p6 }
  0x7b   : > { %p2224_p9 = pnand %p2223_p7, %p2217_p5 }
  0x7d   : > { %2227 = shalt.err (!%p2224_p9)
}
  0x7e   : > { %2057 = dma.hbm_to_vmem [thread:$0]  (!%p2682_p11), %s2691_s15, 128, %s2694_s3, %s2698_s16  }
  0x7f   : > { %s2228_s7 = scalar_lea.hbm %s3059_s5, 512  ;;  %p3117_p3 = scmp.ne.s32.totalorder %s3105_s19, 0 }
  0x80   : > { %p2229_p1 = scmp.ne.s32.totalorder %s3059_s5, %s2228_s7  ;;  %p2235_p5 = scmp.lt.u32.totalorder %s2228_s7, %s3059_s5 }
  0x82   : > { %p2231_p6 = pnand %p2229_p1, %p3117_p3 }
  0x84   : > { %p2232_p8 = pneg %p2231_p6 }
  0x86   : > { %p2237_p10 = pnand %p2235_p5, %p2232_p8 }
  0x88   : > { %2240 = shalt.err (!%p2237_p10)
}
  0x89   : > { %s2241_s21 = scalar_lea.vmem %s369_s20, 512  ;;  %p2249_p0 = scmp.lt.s32.totalorder %s369_s20, %s369_s20 }
  0x8a   : > { %p2242_p2 = scmp.ne.s32.totalorder %s369_s20, %s2241_s21  ;;  %p2250_p7 = scmp.lt.s32.totalorder %s2241_s21, %s2241_s21 }
  0x8c   : > { %p2244_p4 = pnand %p2242_p2, %p3117_p3  ;;  %p2251_p9 = por %p2250_p7, %p2249_p0 }
  0x8e   : > { %p2245_p12 = pneg %p2244_p4 }
  0x90   : > { %p2252_p11 = pnand %p2251_p9, %p2245_p12 }
  0x92   : > { %2255 = shalt.err (!%p2252_p11)
}
  0x93   : > { %p3118_p1 = scmp.ne.s32.totalorder %s3103_s13, 0  ;;  %s3119_s1 = smov 8  }
  0x94   : > { %s3120_s3 = smov 128   ;;  %s2462_s26 = smov [#allocation13]  }
  0x95   : > { %2044 = dma.hbm_to_vmem [thread:$0]  (!%p3118_p1), %s3059_s5, 512, %s369_s20, [#allocation9], %s3120_s3, %s3120_s3, %s3119_s1  }
  0x96   : > { %s398_s7 = sshll.u32 %s2462_s26, 4  ;;  %s2256_s30 = scalar_lea.hbm %s3062_s8, 16  ;;  %s399_s7 = int_to_ptr.vmem [resolvable:$true] %s398_s7 }
  0x97   : > { %p2257_p11 = scmp.ne.s32.totalorder %s3062_s8, %s2256_s30  ;;  %p2263_p5 = scmp.lt.u32.totalorder %s2256_s30, %s3062_s8 }
  0x99   : > { %p2259_p6 = pnand %p2257_p11, %p3117_p3 }
  0x9b   : > { %p2260_p8 = pneg %p2259_p6 }
  0x9d   : > { %p2265_p10 = pnand %p2263_p5, %p2260_p8 }
  0x9f   : > { %2268 = shalt.err (!%p2265_p10)
}
  0xa0   : > { %s2269_s20 = scalar_lea.vmem %s399_s7, 16  ;;  %s2276_s1 = scalar_lea.vmem %s399_s7, 32 }
  0xa1   : > { %p2270_p2 = scmp.ne.s32.totalorder %s399_s7, %s2269_s20  ;;  %p2277_p0 = scmp.lt.s32.totalorder %s399_s7, %s399_s7 }
  0xa2   : > { %p2278_p7 = scmp.lt.s32.totalorder %s2276_s1, %s2269_s20 }
  0xa3   : > { %p2272_p4 = pnand %p2270_p2, %p3117_p3 }
  0xa4   : > { %p2279_p9 = por %p2278_p7, %p2277_p0 }
  0xa5   : > { %p2273_p12 = pneg %p2272_p4 }
  0xa7   : > { %p2280_p13 = pnand %p2279_p9, %p2273_p12 }
  0xa9   : > { %2283 = shalt.err (!%p2280_p13)
}
  0xaa   : > { %2050 = dma.hbm_to_vmem [thread:$0]  (!%p3118_p1), %s3062_s8, 16, %s399_s7, [#allocation12]  }
  0xab   : > { %s2772_s19 = scalar_lea.hbm %s3054_s0, %s2680_s11  ;;  %s419_s15 = scalar_lea.vmem [#allocation2], %s2677_s10 }
  0xac   : > { %s426_s24 = sshll.u32 %s419_s15, 4  ;;  %s3121_s13 = sand.u32 1, %s2450_s23   ;;  %s427_s24 = int_to_ptr.vmem [resolvable:$true] %s426_s24 }
  0xad   : > { %s416_s26 = scalar_lea.sflag [#allocation3], %s3121_s13  ;;  %s2284_s18 = scalar_lea.hbm %s2772_s19, 128 }
  0xae   : > { %p2285_p13 = scmp.ne.s32.totalorder %s2772_s19, %s2284_s18  ;;  %p3122_p3 = scmp.ne.s32.totalorder %s3116_s14, 0 }
  0xaf   : > { %s2289_s30 = scalar_lea.hbm %s3054_s0, 256  ;;  %p2290_p1 = scmp.lt.u32.totalorder %s2772_s19, %s3054_s0 }
  0xb0   : > { %p2287_p11 = pnand %p2285_p13, %p3122_p3  ;;  %p2291_p8 = scmp.lt.u32.totalorder %s2289_s30, %s2284_s18 }
  0xb1   : > { %p2293_p10 = scmp.lt.u32.totalorder %s2284_s18, %s2772_s19 }
  0xb2   : > { %p2288_p6 = pneg %p2287_p11  ;;  %p2292_p5 = por %p2291_p8, %p2290_p1 }
  0xb4   : > { %p2294_p2 = por %p2293_p10, %p2292_p5 }
  0xb6   : > { %p2295_p4 = pnand %p2294_p2, %p2288_p6 }
  0xb8   : > { %2298 = shalt.err (!%p2295_p4)
}
  0xb9   : > { %s2299_s1 = scalar_lea.vmem %s427_s24, 128  ;;  %s2463_s29 = smov [#allocation2]  }
  0xba   : > { %p2300_p12 = scmp.ne.s32.totalorder %s427_s24, %s2299_s1  ;;  %s2304_s3 = sshll.u32 %s2463_s29, 4  ;;  %s2305_s3 = int_to_ptr.vmem [resolvable:$false] %s2304_s3 }
  0xbb   : > { %s2306_s4 = scalar_lea.vmem %s2305_s3, 256  ;;  %p2307_p9 = scmp.lt.s32.totalorder %s427_s24, %s2305_s3 }
  0xbc   : > { %p2302_p0 = pnand %p2300_p12, %p3122_p3  ;;  %p2308_p13 = scmp.lt.s32.totalorder %s2306_s4, %s2299_s1 }
  0xbe   : > { %p2303_p7 = pneg %p2302_p0  ;;  %p2309_p11 = por %p2308_p13, %p2307_p9 }
  0xc0   : > { %p2310_p1 = pnand %p2309_p11, %p2303_p7 }
  0xc2   : > { %2313 = shalt.err (!%p2310_p1)
}
  0xc3   : > { %p3123_p8 = scmp.ne.s32.totalorder %s3114_s17, 0  ;;  %s2798_s13 = scalar_lea.hbm %s3056_s2, %s2680_s11 }
  0xc4   : > { %s455_s18 = scalar_lea.vmem [#allocation7], %s2677_s10  ;;  %s2314_s12 = scalar_lea.hbm %s2798_s13, 128 }
  0xc5   : > { %2054 = dma.hbm_to_vmem [thread:$0]  (!%p3123_p8), %s2772_s19, 128, %s427_s24, %s416_s26  }
  0xc6   : > { %s462_s7 = sshll.u32 %s455_s18, 4  ;;  %p2315_p6 = scmp.ne.s32.totalorder %s2798_s13, %s2314_s12  ;;  %s463_s7 = int_to_ptr.vmem [resolvable:$true] %s462_s7 }
  0xc7   : > { %s2319_s19 = scalar_lea.hbm %s3056_s2, 256  ;;  %p2320_p2 = scmp.lt.u32.totalorder %s2798_s13, %s3056_s2 }
  0xc8   : > { %p2317_p5 = pnand %p2315_p6, %p3122_p3  ;;  %p2321_p4 = scmp.lt.u32.totalorder %s2319_s19, %s2314_s12 }
  0xc9   : > { %p2323_p0 = scmp.lt.u32.totalorder %s2314_s12, %s2798_s13 }
  0xca   : > { %p2318_p10 = pneg %p2317_p5  ;;  %p2322_p12 = por %p2321_p4, %p2320_p2 }
  0xcc   : > { %p2324_p7 = por %p2323_p0, %p2322_p12 }
  0xce   : > { %p2325_p9 = pnand %p2324_p7, %p2318_p10 }
  0xd0   : > { %2328 = shalt.err (!%p2325_p9)
}
  0xd1   : > { %s2329_s10 = scalar_lea.vmem %s463_s7, 128  ;;  %s2464_s11 = smov [#allocation7]  }
  0xd2   : > { %p2330_p13 = scmp.ne.s32.totalorder %s463_s7, %s2329_s10  ;;  %s2334_s20 = sshll.u32 %s2464_s11, 4  ;;  %s2335_s20 = int_to_ptr.vmem [resolvable:$false] %s2334_s20 }
  0xd3   : > { %s2336_s1 = scalar_lea.vmem %s2335_s20, 256  ;;  %p2337_p6 = scmp.lt.s32.totalorder %s463_s7, %s2335_s20 }
  0xd4   : > { %p2332_p11 = pnand %p2330_p13, %p3122_p3  ;;  %p2338_p5 = scmp.lt.s32.totalorder %s2336_s1, %s2329_s10 }
  0xd6   : > { %p2333_p1 = pneg %p2332_p11  ;;  %p2339_p8 = por %p2338_p5, %p2337_p6 }
  0xd8   : > { %p2340_p2 = pnand %p2339_p8, %p2333_p1 }
  0xda   : > { %2343 = shalt.err (!%p2340_p2)
}
  0xdb   : > { %p3124_p4 = scmp.ne.s32.totalorder %s3114_s17, 0  ;;  %p3125_p10 = scmp.ne.s32.totalorder %s3102_s28, 0 }
  0xdc   : > { %s2822_s14 = sand.u32 (!%p3125_p10), 1, %s2446_s22   ;;  %p3126_p3 = scmp.ne.s32.totalorder (!%p3125_p10), %s3109_s25, 0 }
  0xdd   : > { %2060 = dma.hbm_to_vmem [thread:$0]  (!%p3124_p4), %s2798_s13, 128, %s463_s7, %s2698_s16  }
  0xde   : > { %471 = sbr.rel (%p3125_p10) target bundleno = 2106 (0x83a), region = 64  ;;  %s2825_s29 = sshll.u32 (!%p3125_p10), %s2822_s14, 3 }
  0xdf   : > { %s474_s3 = scalar_lea.sflag (!%p3125_p10), [#allocation3], %s2822_s14  ;;  %s477_s4 = scalar_lea.vmem (!%p3125_p10), [#allocation2], %s2825_s29 }
  0xe5   : > { %2417 = dma.done.wait (%p3126_p3), %s474_s3, 128  }
  0xe6   : > { %2419 = vsyncadd (%p3126_p3), %s474_s3, 4294967168  ;;  %s482_s28 = sand.u32 1, %s2563_s27   ;;  %s486_s17 = scalar_lea.vmem [#allocation5], %s2825_s29 }
  0xe7   : > { %s483_s16 = scalar_lea.sflag [#allocation6], %s482_s28 }
  0xe8   : > { %2421 = dma.done.wait (%p3126_p3), %s483_s16, 256  }
  0xe9   : > { %2423 = vsyncadd (%p3126_p3), %s483_s16, 4294967040  ;;  %s495_s9 = scalar_lea.vmem [#allocation7], %s2825_s29  ;;  %p3127_p8 = scmp.eq.s32.totalorder %s2563_s27, 0 }
  0xeb   : > { %2425 = dma.done.wait (%p3127_p8), [#allocation9], 1024   ;;  %p3128_p12 = pmov %p3127_p8 }
  0xec   : > { %p3129_p0 = pmov %p3127_p8 }
  0xed   : > { %2427 = vsyncadd (%p3128_p12), [#allocation9], 4294966272 }
  0xee   : > { %2429 = dma.done.wait (%p3129_p0), [#allocation12], 528   ;;  %p3130_p7 = pmov %p3129_p0 }
  0xef   : > { %v2465_v0 = vmov 0.0|0.0   ;;  %vm2466_vm0 = vmmov 0   ;;  %v2467_v1 = vmov 0.0   ;;  %v655_v2 = vld [vmem:[#allocation10] sm:$0xff]  ;;  %v656_v3 = vld [vmem:[#allocation10 + $0x8] sm:$0xff]  ;;  %v657_v7 = vld [vmem:[#allocation10 + $0x10] sm:$0xff] }
  0xf0   : > { %2431 = vsyncadd (%p3130_p7), [#allocation12], 4294966768  ;;  %1994 = vmatprep.subr.bf16.mxu1 %v2465_v0  ;;  %1988 = vmatprep.subr.bf16.mxu0 %v2465_v0  ;;  %v570_v4 = vld [vmem:[#allocation8] sm:$0xff]  ;;  %v1995_v5 = vpack.c.bf16 %v656_v3, %v655_v2  ;;  %v571_v6 = vld [vmem:[#allocation8 + $0x8] sm:$0xff]  ;;  %vm581_vm1 = vcmask 261120   ;;  %s3131_s7 = sld [smem:[#allocation31_spill]] }
  0xf1   : > { %1923 = vmatprep.mubr.msk.f32.mxu1 %vm2466_vm0, %v2467_v1  ;;  %1912 = vmatprep.mubr.msk.f32.mxu0 %vm2466_vm0, %v2467_v1  ;;  %v658_v8 = vld [vmem:[#allocation10 + $0x18] sm:$0xff]  ;;  %v1989_v9 = vpack.c.bf16 %v571_v6, %v570_v4  ;;  %v572_v10 = vld [vmem:[#allocation8 + $0x10] sm:$0xff]  ;;  %v568_v14 = vld [vmem:[%s486_s17] sm:$0xff]  ;;  %vm824_vm2 = vcmask 64512   ;;  %s2468_s12 = smov 120   ;;  %s2469_s30 = smov 112  }
  0xf2   : > { %v573_v11 = vld [vmem:[#allocation8 + $0x18] sm:$0xff]  ;;  %1996 = vmatpush3.bf16.msra.mxu1 %v1995_v5  ;;  %v1998_v12 = vpack.c.bf16 %v658_v8, %v657_v7  ;;  %v1842_v16 = vld [vmem:[%s3060_s6] ss:$0 sm:$0xff]  ;;  %s2470_s21 = smov 104   ;;  %v739_v25 = vld [vmem:[#allocation11] sm:$0xff]  ;;  %s1839_s19 = sshll.u32 %s2822_s14, 5 }
  0xf3   : > { %1990 = vmatpush3.bf16.msra.mxu0 %v1989_v9  ;;  %1997 = vmatprep.subr.bf16.mxu1 %v2465_v0  ;;  %v1992_v13 = vpack.c.bf16 %v573_v11, %v572_v10  ;;  %v567_v15 = vld [vmem:[%s477_s4] sm:$0xff]  ;;  %v740_v26 = vld [vmem:[#allocation11 + $0x8] sm:$0xff]  ;;  %v1844_v40 = vld [vmem:[#allocation13] ss:$0 sm:$0xff]  ;;  %s2909_s24 = scalar_lea.vmem [#allocation15], %s1839_s19  ;;  %s3132_s11 = sld [smem:[#allocation33_spill]] }
  0xf4   : > { %1991 = vmatprep.subr.bf16.mxu0 %v2465_v0  ;;  %v741_v27 = vld [vmem:[#allocation11 + $0x10] sm:$0xff]  ;;  %v2001_v28 = vpack.c.bf16 %v740_v26, %v739_v25  ;;  %v742_v29 = vld [vmem:[#allocation11 + $0x18] sm:$0xff]  ;;  %s2471_s17 = smov 8   ;;  %s2473_s25 = smov 24   ;;  %vm1510_vm3 = vcmask 130048   ;;  %vm1512_vm4 = vcmask 195584  }
  0xf5   : > { %v2004_v30 = vpack.c.bf16 %v742_v29, %v741_v27  ;;  %v569_v31 = vld [vmem:[%s495_s9] sm:$0xff]  ;;  %s2472_s9 = smov 16   ;;  %s3133_s15 = sld [smem:[#allocation27_spill]] }
  0xf6   : > { %1999 = vmatpush3.bf16.msra.mxu1 %v1998_v12  ;;  %v1840_v17 = vld [vmem:[%s3131_s7] ss:$0 sm:$0xff]  ;;  %s1867_s13 = sshll.u32 %s2563_s27, 9  ;;  %s1631_s18 = sshll.u32 %s2909_s24, 4  ;;  %s2974_s18 = int_to_ptr.vmem [resolvable:$true] %s1631_s18 }
  0xf7   : > { %1993 = vmatpush3.bf16.msra.mxu0 %v1992_v13  ;;  %1937 = vmatprep.subr.mxu1 %v2467_v1  ;;  %s1605_s19 = scalar_lea.sflag [#allocation16], %s2822_s14  ;;  %s2344_s26 = scalar_lea.vmem %s2974_s18, 512 }
  0xf8   : > { %2000 = vmatprep.subr.bf16.mxu0 %v2465_v0  ;;  %p2345_p9 = scmp.ne.s32.totalorder %s2974_s18, %s2344_s26  ;;  %s2474_s10 = smov [#allocation15]  }
  0xf9   : > { %1924 = vmatmul.mubr.msk.f32.vlgmr.msra.gmra.mrb[0].mxu1 %vm581_vm1, %v568_v14  ;;  %s2348_s20 = sshll.u32 %s2474_s10, 4  ;;  %s2349_s20 = int_to_ptr.vmem [resolvable:$false] %s2348_s20 }
  0xfa   : > { %1913 = vmatmul.mubr.msk.f32.vlgmr.msra.gmra.mrb[0].mxu0 %vm581_vm1, %v567_v15  ;;  %1939 = vmatprep.mubr.msk.f32.mxu1 %vm2466_vm0, %v2467_v1  ;;  %p2351_p6 = scmp.lt.s32.totalorder %s2974_s18, %s2349_s20 }
  0xfb   : > { %1934 = vmatprep.mubr.msk.f32.mxu0 %vm2466_vm0, %v2467_v1  ;;  %2002 = vmatpush3.bf16.msra.mxu0 %v2001_v28  ;;  %p3135_p13 = scmp.ne.s32.totalorder %s3133_s15, 0 }
  0xfc   : > { %2003 = vmatprep.subr.bf16.mxu0 %v2465_v0 }
  0xfd   : > { %p2346_p11 = pnand %p2345_p9, %p3135_p13 }
  0xff   : > { %2005 = vmatpush3.bf16.msra.mxu0 %v2004_v30  ;;  %p2347_p1 = pneg %p2346_p11 }
 0x100   : > { %1957 = vmatprep.subr.mxu0 %v2467_v1 }
 0x102   : > { %1935 = vmatmul.mubr.msk.f32.vlgmr.msra.gmra.mrb[2].mxu0 %vm581_vm1, %v569_v31 }
 0x103   : > { %1959 = vmatprep.mubr.msk.f32.mxu0 %vm2466_vm0, %v2467_v1 }
 0x1cc   : > { %v735_v18 = vpop.f32.mrb[0].mxu1 }
 0x1cd   : > { %v736_v19 = vadd.f32 %v1842_v16, %v735_v18  ;;  %v651_v20 = vpop.f32.mrb[0].mxu0  ;;  %v1925_v21 = vpop.f32.mrb[1].mxu1 }
 0x1ce   : > { %v652_v22 = vadd.f32 %v1840_v17, %v651_v20  ;;  %v1914_v23 = vpop.f32.mrb[1].mxu0 }
 0x1cf   : > { %990 = vrot.lane.b32.xlu1 %v736_v19, %s2468_s12  ;;  %1938 = vmatpush3.xpose.msk.msra.mxu1 %vm824_vm2, %v736_v19 }
 0x1d0   : > { %v823_v24 = vmul.f32 0.35355338, %v652_v22  ;;  %1942 = vmatprep.subr.mxu1 %v2467_v1 }
 0x1d2   : > { %1940 = vmatmul.mubr.msk.f32.vlgmr.msra.gmra.mrb[2].mxu1 %vm824_vm2, %v823_v24 }
 0x1d3   : > { %988 = vrot.lane.b32.xlu1 %v823_v24, %s2468_s12  ;;  %1944 = vmatprep.mubr.msk.f32.mxu1 %vm2466_vm0, %v2467_v1 }
 0x1d5   : > { %v819_v41 = vpop.f32.mrb[2].mxu0 }
 0x1d6   : > { %v2894_v42 = vadd.f32 %v1844_v40, %v819_v41  ;;  %v1936_v43 = vpop.f32.mrb[3].mxu0  ;;  %v1514_v41 = vld [vmem:[%s3132_s11] sm:$0xff] }
 0x1d7   : > { %1157 = vrot.lane.b32.xlu1 %v823_v24, %s2469_s30 }
 0x1d8   : > { %1943 = vmatpush3.msra.mxu1 %v2894_v42 }
 0x1d9   : > { %1947 = vmatprep.subr.mxu1 %v2467_v1 }
 0x1db   : > { %1327 = vrot.lane.b32.xlu1 %v736_v19, %s2470_s21 }
 0x1df   : > { %1325 = vrot.lane.b32.xlu1 %v823_v24, %s2470_s21 }
 0x241   : > { %v991_v44 = vpop.permute.xlu1 %990 }
 0x245   : > { %v989_v45 = vpop.permute.xlu1 %988 }
 0x249   : > { %v1158_v46 = vpop.permute.xlu1 %1157 }
 0x24d   : > { %v1328_v49 = vpop.permute.xlu1 %1327 }
 0x251   : > { %v1326_v51 = vpop.permute.xlu1 %1325 }
 0x2a5   : > { %v897_v32 = vpop.f32.mrb[2].mxu1 }
 0x2a6   : > { %v1941_v33 = vpop.f32.mrb[3].mxu1  ;;  %v901_v34 = vsel %vm824_vm2, %v897_v32, -inf }
 0x2a7   : > { %902 = vmax.xlane.f32.xlu0 %v901_v34 }
 0x334   : > { %v903_v35 = vpop.xlane.xlu0 %902 }
 0x335   : > { %v904_v36 = vsub.f32 %v897_v32, %v903_v35 }
 0x337   : > { %v905_v37 = vmul.f32 1.442695, %v904_v36 }
 0x339   : > { %2126 = vpow2.f32 %v905_v37 }
 0x343   : > { %v2127_v38 = vpop.eup %2126 }
 0x344   : > { %v907_v39 = vsel %vm824_vm2, %v2127_v38, 0.0 }
 0x345   : > { %908 = vadd.xlane.f32.xlu0 %v907_v39 }
 0x35b   : > { %1159 = vrot.lane.b32.xlu0 %v736_v19, %s2469_s30 }
 0x3d2   : > { %v909_v47 = vpop.xlane.xlu0 %908 }
 0x3d3   : > { %2128 = vrcp.f32 %v909_v47 }
 0x3d6   : > { %v1160_v48 = vpop.permute.xlu0 %1159 }
 0x3d7   : > { %1958 = vmatpush3.xpose.msk.msra.mxu0 %vm824_vm2, %v1160_v48 }
 0x3d8   : > { %1967 = vmatprep.subr.mxu0 %v2467_v1 }
 0x3da   : > { %1960 = vmatmul.mubr.msk.f32.vlgmr.msra.gmra.mrb[4].mxu0 %vm824_vm2, %v1158_v46 }
 0x3db   : > { %1968 = vmatpush3.xpose.msk.msra.mxu0 %vm824_vm2, %v1328_v49  ;;  %1969 = vmatprep.mubr.msk.f32.mxu0 %vm2466_vm0, %v2467_v1 }
 0x3dc   : > { %2006 = vmatprep.subr.bf16.mxu0 %v2465_v0 }
 0x3dd   : > { %v2129_v50 = vpop.eup %2128 }
 0x3de   : > { %v911_v52 = vmul.f32 %v2129_v50, %v909_v47  ;;  %1970 = vmatmul.mubr.msk.f32.vlgmr.msra.gmra.mrb[6].mxu0 %vm824_vm2, %v1326_v51 }
 0x3df   : > { %1985 = vmatprep.mubr.msk.f32.mxu0 %vm2466_vm0, %v2467_v1 }
 0x3e0   : > { %v912_v53 = vsub.f32 2.0, %v911_v52 }
 0x3e2   : > { %v913_v54 = vmul.f32 %v2129_v50, %v912_v53 }
 0x3e4   : > { %v914_v55 = vmul.f32 %v2127_v38, %v913_v54 }
 0x3e6   : > { %1493 = vst.msk [vmem:[%s2909_s24] sm:$0xff] %vm824_vm2, %v914_v55  ;;  %1945 = vmatmul.mubr.msk.f32.vlgmr.msra.gmra.mrb[4].mxu1 %vm824_vm2, %v914_v55 }
 0x3e7   : > { %1948 = vmatpush3.xpose.msk.msra.mxu1 %vm824_vm2, %v991_v44  ;;  %1949 = vmatprep.mubr.msk.f32.mxu1 %vm2466_vm0, %v2467_v1  ;;  %v1516_v44 = vld [vmem:[%s3132_s11 + $0x10] sm:$0xff] }
 0x3e8   : > { %1952 = vmatprep.subr.mxu1 %v2467_v1 }
 0x3ea   : > { %1950 = vmatmul.mubr.msk.f32.vlgmr.msra.gmra.mrb[6].mxu1 %vm824_vm2, %v989_v45 }
 0x3eb   : > { %1954 = vmatprep.mubr.msk.f32.mxu1 %vm2466_vm0, %v2467_v1 }
 0x4ad   : > { %v1231_v56 = vpop.f32.mrb[4].mxu0 }
 0x4ae   : > { %v1961_v57 = vpop.f32.mrb[5].mxu0  ;;  %v1235_v58 = vsel %vm824_vm2, %v1231_v56, -inf }
 0x4af   : > { %1236 = vmax.xlane.f32.xlu0 %v1235_v58 }
 0x4b1   : > { %v1399_v59 = vpop.f32.mrb[6].mxu0 }
 0x4b2   : > { %v1971_v60 = vpop.f32.mrb[7].mxu0  ;;  %v1403_v4 = vsel %vm824_vm2, %v1399_v59, -inf }
 0x4b9   : > { %v2922_v61 = vpop.f32.mrb[4].mxu1 }
 0x4ba   : > { %v1946_v62 = vpop.f32.mrb[5].mxu1 }
 0x4bd   : > { %v1062_v63 = vpop.f32.mrb[6].mxu1 }
 0x4be   : > { %v1951_v2 = vpop.f32.mrb[7].mxu1  ;;  %v1066_v3 = vsel %vm824_vm2, %v1062_v63, -inf }
 0x4bf   : > { %1067 = vmax.xlane.f32.xlu1 %v1066_v3 }
 0x4c3   : > { %1404 = vmax.xlane.f32.xlu1 %v1403_v4 }
 0x53c   : > { %v1237_v5 = vpop.xlane.xlu0 %1236 }
 0x53d   : > { %v1238_v6 = vsub.f32 %v1231_v56, %v1237_v5 }
 0x53f   : > { %v1239_v7 = vmul.f32 1.442695, %v1238_v6 }
 0x541   : > { %2130 = vpow2.f32 %v1239_v7 }
 0x54b   : > { %v2131_v8 = vpop.eup %2130 }
 0x54c   : > { %v1068_v9 = vpop.xlane.xlu1 %1067  ;;  %v1241_v10 = vsel %vm824_vm2, %v2131_v8, 0.0 }
 0x54d   : > { %1242 = vadd.xlane.f32.xlu0 %v1241_v10  ;;  %v1069_v11 = vsub.f32 %v1062_v63, %v1068_v9 }
 0x54f   : > { %v1070_v14 = vmul.f32 1.442695, %v1069_v11 }
 0x550   : > { %v1405_v12 = vpop.xlane.xlu1 %1404 }
 0x551   : > { %v1406_v13 = vsub.f32 %v1399_v59, %v1405_v12 }
 0x553   : > { %v1407_v15 = vmul.f32 1.442695, %v1406_v13 }
 0x555   : > { %2132 = vpow2.f32 %v1407_v15 }
 0x556   : > { %2134 = vpow2.f32 %v1070_v14 }
 0x55f   : > { %v2133_v16 = vpop.eup %2132 }
 0x560   : > { %v1409_v17 = vsel %vm824_vm2, %v2133_v16, 0.0  ;;  %v2135_v18 = vpop.eup %2134 }
 0x561   : > { %1410 = vadd.xlane.f32.xlu1 %v1409_v17  ;;  %v1072_v19 = vsel %vm824_vm2, %v2135_v18, 0.0 }
 0x563   : > { %1081 = vrot.lane.b32.xlu0 %v2894_v42, %s2468_s12 }
 0x565   : > { %1073 = vadd.xlane.f32.xlu1 %v1072_v19 }
 0x576   : > { %1249 = vrot.lane.b32.xlu1 %v2894_v42, %s2469_s30  ;;  %s3134_s30 = sld [smem:[#allocation36_spill]] }
 0x57a   : > { %1417 = vrot.lane.b32.xlu1 %v2894_v42, %s2470_s21  ;;  %v1515_v42 = vld [vmem:[%s3132_s11 + $0x8] sm:$0xff] }
 0x57b   : > { %v2007_v43 = vpack.c.bf16 %v1515_v42, %v1514_v41 }
 0x57c   : > { %s2972_s21 = scalar_lea.hbm %s3134_s30, %s1867_s13 }
 0x57d   : > { %2008 = vmatpush3.bf16.msra.mxu0 %v2007_v43 }
 0x57e   : > { %2009 = vmatprep.subr.bf16.mxu0 %v2465_v0 }
 0x5da   : > { %v1243_v20 = vpop.xlane.xlu0 %1242 }
 0x5db   : > { %2136 = vrcp.f32 %v1243_v20 }
 0x5de   : > { %v1082_v21 = vpop.permute.xlu0 %1081 }
 0x5df   : > { %1953 = vmatpush3.msra.mxu1 %v1082_v21 }
 0x5e0   : > { %1962 = vmatprep.subr.mxu1 %v2467_v1 }
 0x5e5   : > { %v2137_v22 = vpop.eup %2136 }
 0x5e6   : > { %v1245_v23 = vmul.f32 %v2137_v22, %v1243_v20 }
 0x5e8   : > { %v1246_v24 = vsub.f32 2.0, %v1245_v23 }
 0x5ea   : > { %v1247_v25 = vmul.f32 %v2137_v22, %v1246_v24 }
 0x5ec   : > { %v1248_v26 = vmul.f32 %v2131_v8, %v1247_v25 }
 0x5ee   : > { %1495 = vst.msk [vmem:[%s2909_s24 + $0x10] sm:$0xff] %vm824_vm2, %v1248_v26  ;;  %v1411_v27 = vpop.xlane.xlu1 %1410 }
 0x5ef   : > { %2138 = vrcp.f32 %v1411_v27 }
 0x5f2   : > { %v1074_v28 = vpop.xlane.xlu1 %1073 }
 0x5f3   : > { %2140 = vrcp.f32 %v1074_v28 }
 0x5f6   : > { %v1250_v39 = vpop.permute.xlu1 %1249 }
 0x5f9   : > { %v2139_v29 = vpop.eup %2138 }
 0x5fa   : > { %v1413_v30 = vmul.f32 %v2139_v29, %v1411_v27  ;;  %v1418_v40 = vpop.permute.xlu1 %1417 }
 0x5fc   : > { %v1414_v31 = vsub.f32 2.0, %v1413_v30 }
 0x5fd   : > { %v2141_v32 = vpop.eup %2140 }
 0x5fe   : > { %v1415_v33 = vmul.f32 %v2139_v29, %v1414_v31  ;;  %v1076_v34 = vmul.f32 %v2141_v32, %v1074_v28 }
 0x600   : > { %v1416_v35 = vmul.f32 %v2133_v16, %v1415_v33  ;;  %v1077_v36 = vsub.f32 2.0, %v1076_v34 }
 0x602   : > { %1496 = vst.msk [vmem:[%s2909_s24 + $0x18] sm:$0xff] %vm824_vm2, %v1416_v35  ;;  %v1078_v37 = vmul.f32 %v2141_v32, %v1077_v36 }
 0x604   : > { %v1079_v38 = vmul.f32 %v2135_v18, %v1078_v37 }
 0x606   : > { %1494 = vst.msk [vmem:[%s2909_s24 + $0x8] sm:$0xff] %vm824_vm2, %v1079_v38  ;;  %1955 = vmatmul.mubr.msk.f32.vlgmr.msra.gmra.mrb[8].mxu1 %vm824_vm2, %v1079_v38  ;;  %s2350_s24 = scalar_lea.vmem %s2349_s20, 1024 }
 0x607   : > { %1963 = vmatpush3.msra.mxu1 %v1250_v39  ;;  %1964 = vmatprep.mubr.msk.f32.mxu1 %vm2466_vm0, %v2467_v1  ;;  %p2352_p5 = scmp.lt.s32.totalorder %s2350_s24, %s2344_s26 }
 0x608   : > { %1972 = vmatprep.subr.mxu1 %v2467_v1 }
 0x609   : > { %p2353_p2 = por %p2352_p5, %p2351_p6 }
 0x60a   : > { %1965 = vmatmul.mubr.msk.f32.vlgmr.msra.gmra.mrb[10].mxu1 %vm824_vm2, %v1248_v26 }
 0x60b   : > { %1973 = vmatpush3.msra.mxu1 %v1418_v40  ;;  %1974 = vmatprep.mubr.msk.f32.mxu1 %vm2466_vm0, %v2467_v1  ;;  %v1517_v1 = vld [vmem:[%s3132_s11 + $0x18] sm:$0xff]  ;;  %p2354_p4 = pnand %p2353_p2, %p2347_p1 }
 0x60c   : > { %v2010_v45 = vpack.c.bf16 %v1517_v1, %v1516_v44 }
 0x60e   : > { %1975 = vmatmul.mubr.msk.f32.vlgmr.msra.gmra.mrb[12].mxu1 %vm824_vm2, %v1416_v35  ;;  %2011 = vmatpush3.bf16.msra.mxu0 %v2010_v45 }
 0x6d9   : > { %v1153_v46 = vpop.f32.mrb[8].mxu1 }
 0x6da   : > { %1498 = vrot.lane.b32.xlu0 %v1153_v46, %s2471_s17  ;;  %v1956_v47 = vpop.f32.mrb[9].mxu1 }
 0x6dd   : > { %v1321_v48 = vpop.f32.mrb[10].mxu1 }
 0x6de   : > { %1502 = vrot.lane.b32.xlu1 %v1321_v48, %s2472_s9  ;;  %v1966_v0 = vpop.f32.mrb[11].mxu1 }
 0x6e1   : > { %v1489_v49 = vpop.f32.mrb[12].mxu1 }
 0x6e2   : > { %1506 = vrot.lane.b32.xlu0 %v1489_v49, %s2473_s25  ;;  %v1976_v50 = vpop.f32.mrb[13].mxu1 }
 0x74c   : > { %v1499_v51 = vpop.permute.xlu0 %1498 }
 0x74d   : > { %v1509_v53 = vsel %vm824_vm2, %v2922_v61, %v1499_v51 }
 0x750   : > { %v1503_v52 = vpop.permute.xlu1 %1502 }
 0x751   : > { %v1511_v54 = vsel %vm1510_vm3, %v1509_v53, %v1503_v52 }
 0x754   : > { %v1507_v55 = vpop.permute.xlu0 %1506 }
 0x755   : > { %v1513_v56 = vsel %vm1512_vm4, %v1511_v54, %v1507_v55 }
 0x756   : > { %1986 = vmatmul.mubr.msk.f32.vlgmr.msra.gmra.mrb[8].mxu0 %vm581_vm1, %v1513_v56 }
 0x757   : > { %2357 = shalt.err (!%p2354_p4)
}
 0x758   : > { %s2358_s1 = scalar_lea.hbm %s2972_s21, 512  ;;  %s2362_s28 = scalar_lea.hbm %s3134_s30, 1024 }
 0x759   : > { %p2359_p10 = scmp.ne.s32.totalorder %s2972_s21, %s2358_s1  ;;  %p2363_p12 = scmp.lt.u32.totalorder %s2972_s21, %s3134_s30 }
 0x75a   : > { %p2364_p0 = scmp.lt.u32.totalorder %s2362_s28, %s2358_s1  ;;  %p2366_p9 = scmp.lt.u32.totalorder %s2358_s1, %s2972_s21 }
 0x75b   : > { %p2360_p3 = pnand %p2359_p10, %p3135_p13 }
 0x75c   : > { %p2365_p7 = por %p2364_p0, %p2363_p12 }
 0x75d   : > { %p2361_p8 = pneg %p2360_p3 }
 0x75e   : > { %p2367_p11 = por %p2366_p9, %p2365_p7 }
 0x760   : > { %p2368_p1 = pnand %p2367_p11, %p2361_p8 }
 0x762   : > { %2371 = shalt.err (!%p2368_p1)
}
 0x763   : > { %s2475_s25 = smov 128   ;;  %s3136_s12 = sld [smem:[#allocation34_spill]] }
 0x764   : > { %2035 = dma.vmem_to_hbm [thread:$0]  (%p3135_p13), %s2974_s18, 512, %s2972_s21, %s1605_s19, %s2475_s25, %s2475_s25, %s2471_s17  }
 0x765   : > { %s1862_s26 = sshll.u32 %s2563_s27, 7  ;;  %s559_s10 = scalar_lea.vmem [#allocation14], %s2825_s29 }
 0x766   : > { %s1618_s20 = sshll.u32 %s559_s10, 4  ;;  %s3137_s3 = sld [smem:[#allocation35_spill]]  ;;  %s3011_s20 = int_to_ptr.vmem [resolvable:$true] %s1618_s20 }
 0x767   : > { %s1600_s17 = scalar_lea.sflag [#allocation4], %s2822_s14  ;;  %s2372_s18 = scalar_lea.vmem %s3011_s20, 128 }
 0x768   : > { %p2373_p6 = scmp.ne.s32.totalorder %s3011_s20, %s2372_s18  ;;  %s2476_s27 = smov [#allocation14]  }
 0x769   : > { %v1858_v57 = vld [vmem:[%s3136_s12] ss:$0 sm:$0xff]  ;;  %s2376_s29 = sshll.u32 %s2476_s27, 4  ;;  %s2377_s29 = int_to_ptr.vmem [resolvable:$false] %s2376_s29 }
 0x76a   : > { %p2374_p5 = pnand %p2373_p6, %p3135_p13  ;;  %s2378_s21 = scalar_lea.vmem %s2377_s29, 256 }
 0x76b   : > { %p2379_p4 = scmp.lt.s32.totalorder %s3011_s20, %s2377_s29  ;;  %p2380_p10 = scmp.lt.s32.totalorder %s2378_s21, %s2372_s18 }
 0x76c   : > { %s3009_s4 = scalar_lea.hbm %s3137_s3, %s1862_s26  ;;  %p2375_p2 = pneg %p2374_p5 }
 0x76d   : > { %p2381_p3 = por %p2380_p10, %p2379_p4 }
 0x76f   : > { %p2382_p8 = pnand %p2381_p3, %p2375_p2 }
 0x829   : > { %v1594_v58 = vpop.f32.mrb[8].mxu0 }
 0x82a   : > { %v1595_v59 = vadd.f32 %v1858_v57, %v1594_v58  ;;  %v1987_v60 = vpop.f32.mrb[9].mxu0 }
 0x82c   : > { %1598 = vst.msk [vmem:[%s559_s10] sm:$0xff] %vm581_vm1, %v1595_v59 }
 0x82d   : > { %2385 = shalt.err (!%p2382_p8)
}
 0x82e   : > { %s2386_s14 = scalar_lea.hbm %s3009_s4, 128  ;;  %s2390_s16 = scalar_lea.hbm %s3137_s3, 256 }
 0x82f   : > { %p2387_p12 = scmp.ne.s32.totalorder %s3009_s4, %s2386_s14  ;;  %p2391_p9 = scmp.lt.u32.totalorder %s3009_s4, %s3137_s3 }
 0x830   : > { %p2392_p11 = scmp.lt.u32.totalorder %s2390_s16, %s2386_s14  ;;  %p2394_p6 = scmp.lt.u32.totalorder %s2386_s14, %s3009_s4 }
 0x831   : > { %p2388_p0 = pnand %p2387_p12, %p3135_p13 }
 0x832   : > { %p2393_p1 = por %p2392_p11, %p2391_p9 }
 0x833   : > { %p2389_p7 = pneg %p2388_p0 }
 0x834   : > { %p2395_p5 = por %p2394_p6, %p2393_p1 }
 0x836   : > { %p2396_p2 = pnand %p2395_p5, %p2389_p7 }
 0x838   : > { %2399 = shalt.err (!%p2396_p2)
}
 0x839   : > { %2034 = dma.vmem_to_hbm [thread:$0]  (%p3135_p13), %s3011_s20, 128, %s3009_s4, %s1600_s17  }
 0x83a PF: > { %s3138_s13 = sld [smem:[#allocation23_spill]]  ;;  %s3139_s7 = sld [smem:[#allocation28_spill]] }
 0x83b   : > { %s3140_s12 = sld [smem:[#allocation24_spill]] }
 0x840   : > { %s1646_s26 = sand.u32 1, %s3138_s13   ;;  %p3141_p4 = scmp.ne.s32.totalorder %s3139_s7, 0 }
 0x841   : > { %p3142_p10 = scmp.ge.s32.totalorder %s3140_s12, 2  ;;  %s1647_s10 = scalar_lea.sflag [#allocation4], %s1646_s26 }
 0x843   : > { %p2062_p3 = pnand %p3142_p10, %p3141_p4 }
 0x845   : > { %2433 = dma.done.wait (!%p2062_p3), %s1647_s10, 128  }
 0x846   : > { %2435 = vsyncadd (!%p2062_p3), %s1647_s10, 4294967168  ;;  %s1656_s24 = scalar_lea.sflag [#allocation16], %s1646_s26 }
 0x847   : > { %2437 = dma.done.wait (!%p2062_p3), %s1656_s24, 512  }
 0x848   : > { %2439 = vsyncadd (!%p2062_p3), %s1656_s24, 4294966784  ;;  %s3143_s24 = sld [smem:[#allocation25_spill]]  ;;  %s3144_s15 = sld [smem:[#allocation26_spill]] }
 0x849   : > { %s3145_s21 = smov %s2446_s22  ;;  %s3146_s22 = smov %s2450_s23 }
 0x84e   : > { %p34_p13 = scmp.ge.s32.totalorder %s3143_s24, 4   ;;  %s3147_s23 = smov %s3144_s15 }
 0x850   :  { %36 = sbr.rel (!%p34_p13) target bundleno = 20 (0x14), region = 166 }
 0x857   :  { %1661 = vsyncpa [#allocation3], 1 }
 0x858   :  { %1663 = vsyncpa [#allocation3 + $0x1], 1 }
 0x859   :  { %1664 = vsyncpa [#allocation6], 1 }
 0x85a   :  { %1666 = vsyncpa [#allocation6 + $0x1], 1 }
 0x85b   :  { %1667 = vsyncpa [#allocation9], 1 }
 0x85c   :  { %1668 = vsyncpa [#allocation12], 1 }
 0x85d   :  { %1669 = vsyncpa [#allocation4], 1 }
 0x85e   :  { %1671 = vsyncpa [#allocation4 + $0x1], 1 }
 0x85f   :  { %1672 = vsyncpa [#allocation16], 1 }
 0x860   :  { %1674 = vsyncpa [#allocation16 + $0x1], 1 }

</bundles_post_ra>
